<compile_context>
chip_gen: v5e
topology: v5e:2x2
jax: 0.10.0
libtpu: 0.0.40
codegen_flags: <defaults>
</compile_context>

<pallas_src>
import jax
import jax.numpy as jnp
from jax.experimental import pallas as pl
from jax.experimental.pallas import tpu as pltpu


# ----------------------------- Pallas kernel ---------------------------------
def dnn_kernel(x_ref,
               w1_ref, b1_ref,
               w2_ref, b2_ref,
               w3_ref, b3_ref,
               w4_ref, b4_ref,
               o_ref):
    bf16 = jnp.bfloat16
    f32 = jnp.float32

    x = x_ref[...].astype(bf16)          # no-op if the caller already feeds bf16

    # fc1 -> relu        (dropout1 = identity in eval; BN1 folded into fc2)
    h = jnp.dot(x, w1_ref[...], preferred_element_type=f32)
    h = jnp.maximum(h + b1_ref[...], 0.0).astype(bf16)

    # fc2' (BN1-folded) -> relu      (BN2 folded into fc3)
    h = jnp.dot(h, w2_ref[...], preferred_element_type=f32)
    h = jnp.maximum(h + b2_ref[...], 0.0).astype(bf16)

    # fc3' (BN2-folded) -> relu      (BN3 folded into fc4)
    h = jnp.dot(h, w3_ref[...], preferred_element_type=f32)
    h = jnp.maximum(h + b3_ref[...], 0.0).astype(bf16)

    # fc4' (BN3-folded): single output column, stored directly as (tile_b, 1)
    o_ref[...] = jnp.dot(h, w4_ref[...], preferred_element_type=f32) + b4_ref[...]


# ------------------------------ wrapper ---------------------------------------
def _round_up(n, m):
    return ((n + m - 1) // m) * m


def _default_tile_b(b_rows):
    """Biggest-tile-that-makes-sense heuristic.

    Large tiles amortize the ~0.35 us/grid-step pipeline overhead; cap at 2048
    rows so double-buffered x/out slabs stay well under scoped VMEM on all
    generations.  On dual-TensorCore chips (v7x) prefer >=2 evenly sized grid
    steps so the "parallel" batch axis is spread over both cores; on v5e/v6e
    (single TC) one big tile wins.
    """
    cap = 2048
    kind = ""
    try:
        kind = (jax.devices()[0].device_kind or "").lower()
    except Exception:
        pass
    dual_core = "v7" in kind or "7x" in kind
    if dual_core and b_rows >= 16:
        return min(_round_up(pl.cdiv(b_rows, 2), 8), cap)
    return min(_round_up(b_rows, 8), cap)


def dnn_forward(x, fp, *, tile_b=None):
    """x: (B, input_d) f32 or bf16.  fp: folded params (see fold_params).

    Returns (B, 1) f32."""
    B, D = x.shape
    if tile_b is None:
        tile_b = _default_tile_b(max(B, 8))
    tile_b = max(8, min(_round_up(tile_b, 8), _round_up(B, 8)))
    Bp = _round_up(B, tile_b)
    if Bp != B:
        x = jnp.pad(x, ((0, Bp - B), (0, 0)))

    operands = (x,
                fp["w1"], fp["b1"],
                fp["w2"], fp["b2"],
                fp["w3"], fp["b3"],
                fp["w4"], fp["b4"])

    def const_spec(a):
        # Same block index every grid step -> parameters stay resident in VMEM.
        return pl.BlockSpec(a.shape, lambda i: (0, 0))

    in_specs = [pl.BlockSpec((tile_b, D), lambda i: (i, 0))] + \
               [const_spec(a) for a in operands[1:]]
    out_spec = pl.BlockSpec((tile_b, 1), lambda i: (i, 0))

    out = pl.pallas_call(
        dnn_kernel,
        out_shape=jax.ShapeDtypeStruct((Bp, 1), jnp.float32),
        grid=(Bp // tile_b,),
        in_specs=in_specs,
        out_specs=out_spec,
        compiler_params=pltpu.CompilerParams(
            dimension_semantics=("parallel",)),
    )(*operands)
    return out if Bp == B else out[:B]


# ------------------------- deterministic parameter init -----------------------
def init_raw_params(key, input_d=23, layer1=64, layer2=32, layer3=32):
    """PyTorch-style init of the original module's parameters + BN running stats."""
    ks = jax.random.split(key, 20)

    def linear(kw, kb, fan_in, fan_out):
        bound = float(fan_in) ** -0.5
        w = jax.random.uniform(kw, (fan_in, fan_out), jnp.float32, -bound, bound)
        b = jax.random.uniform(kb, (1, fan_out), jnp.float32, -bound, bound)
        return w, b

    def bn(kg, kb, km, kv, n):
        gamma = 1.0 + 0.1 * jax.random.normal(kg, (1, n), jnp.float32)
        beta = 0.1 * jax.random.normal(kb, (1, n), jnp.float32)
        rmean = 0.1 * jax.random.normal(km, (1, n), jnp.float32)
        rvar = 1.0 + 0.1 * jax.random.uniform(kv, (1, n), jnp.float32)
        return gamma, beta, rmean, rvar

    w1, b1 = linear(ks[0], ks[1], input_d, layer1)
    w2, b2 = linear(ks[2], ks[3], layer1, layer2)
    w3, b3 = linear(ks[4], ks[5], layer2, layer3)
    w4, b4 = linear(ks[6], ks[7], layer3, 1)
    g1, be1, m1, v1 = bn(ks[8], ks[9], ks[10], ks[11], layer1)
    g2, be2, m2, v2 = bn(ks[12], ks[13], ks[14], ks[15], layer2)
    g3, be3, m3, v3 = bn(ks[16], ks[17], ks[18], ks[19], layer3)

    return dict(w1=w1, b1=b1, w2=w2, b2=b2, w3=w3, b3=b3, w4=w4, b4=b4,
                g1=g1, be1=be1, m1=m1, v1=v1,
                g2=g2, be2=be2, m2=m2, v2=v2,
                g3=g3, be3=be3, m3=m3, v3=v3)


def fold_params(p, eps=1e-5):
    """Fold each BN (eval-mode affine) into the following linear layer.

    relu(z) * s + t followed by @W + b  ==  relu(z) @ (diag(s) @ W) + (t @ W + b).
    Exact because dropout is identity in eval mode.  Weights cast to bf16 for
    the MXU, biases kept f32.  fc4 stays a single output column (no padding).
    """
    def bn_affine(g, be, m, v):
        scale = g / jnp.sqrt(v + eps)
        shift = be - m * scale
        return scale, shift

    s1, t1 = bn_affine(p["g1"], p["be1"], p["m1"], p["v1"])
    s2, t2 = bn_affine(p["g2"], p["be2"], p["m2"], p["v2"])
    s3, t3 = bn_affine(p["g3"], p["be3"], p["m3"], p["v3"])

    w1, b1 = p["w1"], p["b1"]
    w2 = p["w2"] * s1.reshape(-1, 1)
    b2 = t1 @ p["w2"] + p["b2"]
    w3 = p["w3"] * s2.reshape(-1, 1)
    b3 = t2 @ p["w3"] + p["b3"]
    w4 = p["w4"] * s3.reshape(-1, 1)          # (layer3, 1)
    b4 = t3 @ p["w4"] + p["b4"]               # (1, 1)

    bf16 = jnp.bfloat16
    return dict(w1=w1.astype(bf16), b1=b1,
                w2=w2.astype(bf16), b2=b2,
                w3=w3.astype(bf16), b3=b3,
                w4=w4.astype(bf16), b4=b4)


# ------------------------------ references ------------------------------------
def ref_f32(x, p, eps=1e-5):
    """Full-precision eval-mode forward of the original module."""
    def bn(h, g, be, m, v):
        return (h - m) / jnp.sqrt(v + eps) * g + be

    h = jnp.maximum(x @ p["w1"] + p["b1"], 0.0)
    h = bn(h, p["g1"], p["be1"], p["m1"], p["v1"])
    h = jnp.maximum(h @ p["w2"] + p["b2"], 0.0)
    h = bn(h, p["g2"], p["be2"], p["m2"], p["v2"])
    h = jnp.maximum(h @ p["w3"] + p["b3"], 0.0)
    h = bn(h, p["g3"], p["be3"], p["m3"], p["v3"])
    return h @ p["w4"] + p["b4"]


def ref_folded_bf16(x, fp):
    """Same math as the kernel (folded BN, bf16 matmul operands, f32 accum)."""
    bf16, f32 = jnp.bfloat16, jnp.float32
    h = jnp.dot(x.astype(bf16), fp["w1"], preferred_element_type=f32)
    h = jnp.maximum(h + fp["b1"], 0.0).astype(bf16)
    h = jnp.dot(h, fp["w2"], preferred_element_type=f32)
    h = jnp.maximum(h + fp["b2"], 0.0).astype(bf16)
    h = jnp.dot(h, fp["w3"], preferred_element_type=f32)
    h = jnp.maximum(h + fp["b3"], 0.0).astype(bf16)
    return jnp.dot(h, fp["w4"], preferred_element_type=f32) + fp["b4"]


# --------------------------------- main ----------------------------------------
if __name__ == "__main__":
    key = jax.random.PRNGKey(0)
    kx, kp = jax.random.split(key)

    B, INPUT_D = 512, 23
    x = jax.random.normal(kx, (B, INPUT_D), jnp.float32)
    raw = init_raw_params(kp, input_d=INPUT_D)
    fp = fold_params(raw)

    out = dnn_forward(x, fp)      # v5e/v6e: tile_b=512, grid=(1,); v7x: 256 x 2
    jax.block_until_ready(out)
    assert out.shape == (B, 1)

    # Check 1: identical math path (folded BN + bf16 matmul operands) -> tight,
    # with a little slack for K-reduction reassociation differences.
    exp_bf16 = ref_folded_bf16(x, fp)
    assert jnp.allclose(out, exp_bf16, atol=5e-3, rtol=5e-3), \
        "mismatch vs folded bf16 reference"

    # Check 2: full-precision eval-mode forward of the original module -> loose
    # (expected bf16 matmul-operand rounding only).
    exp_f32 = ref_f32(x, raw)
    assert jnp.allclose(out, exp_f32, atol=5e-2, rtol=5e-2), \
        "mismatch vs f32 module reference"

    print("KERNEL_OK")
</pallas_src>

<mosaic_0001>
module attributes {stable_mosaic.version = 11 : i64} {
  func.func @dnn_kernel(%arg0: i32, %arg1: memref<512x23xf32, #tpu.memory_space<vmem>>, %arg2: memref<23x64xbf16, #tpu.memory_space<vmem>>, %arg3: memref<1x64xf32, #tpu.memory_space<vmem>>, %arg4: memref<64x32xbf16, #tpu.memory_space<vmem>>, %arg5: memref<1x32xf32, #tpu.memory_space<vmem>>, %arg6: memref<32x32xbf16, #tpu.memory_space<vmem>>, %arg7: memref<1x32xf32, #tpu.memory_space<vmem>>, %arg8: memref<32x1xbf16, #tpu.memory_space<vmem>>, %arg9: memref<1x1xf32, #tpu.memory_space<vmem>>, %arg10: memref<512x1xf32, #tpu.memory_space<vmem>>) attributes {dimension_semantics = [#tpu.dimension_semantics<parallel>], iteration_bounds = array<i64: 1>, scalar_prefetch = 0 : i64, scratch_operands = 0 : i64, tpu.core_type = #tpu.core_type<tc>, window_params = [{transform_indices = @transform_0, window_bounds = array<i64: 512, 23>}, {pipeline_mode = #tpu.pipeline_mode<synchronous>, transform_indices = @transform_1, window_bounds = array<i64: 23, 64>}, {pipeline_mode = #tpu.pipeline_mode<synchronous>, transform_indices = @transform_2, window_bounds = array<i64: 1, 64>}, {pipeline_mode = #tpu.pipeline_mode<synchronous>, transform_indices = @transform_3, window_bounds = array<i64: 64, 32>}, {pipeline_mode = #tpu.pipeline_mode<synchronous>, transform_indices = @transform_4, window_bounds = array<i64: 1, 32>}, {pipeline_mode = #tpu.pipeline_mode<synchronous>, transform_indices = @transform_5, window_bounds = array<i64: 32, 32>}, {pipeline_mode = #tpu.pipeline_mode<synchronous>, transform_indices = @transform_6, window_bounds = array<i64: 1, 32>}, {pipeline_mode = #tpu.pipeline_mode<synchronous>, transform_indices = @transform_7, window_bounds = array<i64: 32, 1>}, {pipeline_mode = #tpu.pipeline_mode<synchronous>, transform_indices = @transform_8, window_bounds = array<i64: 1, 1>}, {transform_indices = @transform_9, window_bounds = array<i64: 512, 1>}]} {
    %c0 = arith.constant 0 : index
    %c0_0 = arith.constant 0 : index
    %0 = vector.load %arg1[%c0, %c0_0] : memref<512x23xf32, #tpu.memory_space<vmem>>, vector<512x23xf32>
    %1 = arith.truncf %0 : vector<512x23xf32> to vector<512x23xbf16>
    %c0_1 = arith.constant 0 : index
    %c0_2 = arith.constant 0 : index
    %2 = vector.load %arg2[%c0_1, %c0_2] : memref<23x64xbf16, #tpu.memory_space<vmem>>, vector<23x64xbf16>
    %cst = arith.constant dense<0.000000e+00> : vector<512x64xf32>
    %3 = tpu.matmul %1, %2, %cst {dimension_numbers = #tpu.dot_dimension_numbers<[1], [0], [0], [1], [0, 0, 1, 1], [], []>} : vector<512x23xbf16>, vector<23x64xbf16>, vector<512x64xf32> -> vector<512x64xf32>
    %c0_3 = arith.constant 0 : index
    %c0_4 = arith.constant 0 : index
    %4 = vector.load %arg3[%c0_3, %c0_4] : memref<1x64xf32, #tpu.memory_space<vmem>>, vector<1x64xf32>
    %5 = vector.broadcast %4 : vector<1x64xf32> to vector<512x64xf32>
    %6 = arith.addf %3, %5 : vector<512x64xf32>
    %cst_5 = arith.constant 0.000000e+00 : f32
    %7 = vector.broadcast %cst_5 : f32 to vector<512x64xf32>
    %8 = arith.maximumf %6, %7 : vector<512x64xf32>
    %9 = arith.truncf %8 : vector<512x64xf32> to vector<512x64xbf16>
    %c0_6 = arith.constant 0 : index
    %c0_7 = arith.constant 0 : index
    %10 = vector.load %arg4[%c0_6, %c0_7] : memref<64x32xbf16, #tpu.memory_space<vmem>>, vector<64x32xbf16>
    %cst_8 = arith.constant dense<0.000000e+00> : vector<512x32xf32>
    %11 = tpu.matmul %9, %10, %cst_8 {dimension_numbers = #tpu.dot_dimension_numbers<[1], [0], [0], [1], [0, 0, 1, 1], [], []>} : vector<512x64xbf16>, vector<64x32xbf16>, vector<512x32xf32> -> vector<512x32xf32>
    %c0_9 = arith.constant 0 : index
    %c0_10 = arith.constant 0 : index
    %12 = vector.load %arg5[%c0_9, %c0_10] : memref<1x32xf32, #tpu.memory_space<vmem>>, vector<1x32xf32>
    %13 = vector.broadcast %12 : vector<1x32xf32> to vector<512x32xf32>
    %14 = arith.addf %11, %13 : vector<512x32xf32>
    %cst_11 = arith.constant 0.000000e+00 : f32
    %15 = vector.broadcast %cst_11 : f32 to vector<512x32xf32>
    %16 = arith.maximumf %14, %15 : vector<512x32xf32>
    %17 = arith.truncf %16 : vector<512x32xf32> to vector<512x32xbf16>
    %c0_12 = arith.constant 0 : index
    %c0_13 = arith.constant 0 : index
    %18 = vector.load %arg6[%c0_12, %c0_13] : memref<32x32xbf16, #tpu.memory_space<vmem>>, vector<32x32xbf16>
    %cst_14 = arith.constant dense<0.000000e+00> : vector<512x32xf32>
    %19 = tpu.matmul %17, %18, %cst_14 {dimension_numbers = #tpu.dot_dimension_numbers<[1], [0], [0], [1], [0, 0, 1, 1], [], []>} : vector<512x32xbf16>, vector<32x32xbf16>, vector<512x32xf32> -> vector<512x32xf32>
    %c0_15 = arith.constant 0 : index
    %c0_16 = arith.constant 0 : index
    %20 = vector.load %arg7[%c0_15, %c0_16] : memref<1x32xf32, #tpu.memory_space<vmem>>, vector<1x32xf32>
    %21 = vector.broadcast %20 : vector<1x32xf32> to vector<512x32xf32>
    %22 = arith.addf %19, %21 : vector<512x32xf32>
    %cst_17 = arith.constant 0.000000e+00 : f32
    %23 = vector.broadcast %cst_17 : f32 to vector<512x32xf32>
    %24 = arith.maximumf %22, %23 : vector<512x32xf32>
    %25 = arith.truncf %24 : vector<512x32xf32> to vector<512x32xbf16>
    %c0_18 = arith.constant 0 : index
    %c0_19 = arith.constant 0 : index
    %26 = vector.load %arg8[%c0_18, %c0_19] : memref<32x1xbf16, #tpu.memory_space<vmem>>, vector<32x1xbf16>
    %cst_20 = arith.constant dense<0.000000e+00> : vector<512x1xf32>
    %27 = tpu.matmul %25, %26, %cst_20 {dimension_numbers = #tpu.dot_dimension_numbers<[1], [0], [0], [1], [0, 0, 1, 1], [], []>} : vector<512x32xbf16>, vector<32x1xbf16>, vector<512x1xf32> -> vector<512x1xf32>
    %c0_21 = arith.constant 0 : index
    %c0_22 = arith.constant 0 : index
    %28 = vector.load %arg9[%c0_21, %c0_22] : memref<1x1xf32, #tpu.memory_space<vmem>>, vector<1x1xf32>
    %29 = vector.broadcast %28 : vector<1x1xf32> to vector<512x1xf32>
    %30 = arith.addf %27, %29 : vector<512x1xf32>
    %c0_23 = arith.constant 0 : index
    %c0_24 = arith.constant 0 : index
    %31 = vector.load %arg10[%c0_23, %c0_24] : memref<512x1xf32, #tpu.memory_space<vmem>>, vector<512x1xf32>
    tpu.vector_store %arg10[%c0_23, %c0_24], %30 {strides = array<i32>} : memref<512x1xf32, #tpu.memory_space<vmem>>, vector<512x1xf32>,
    return
  }
  func.func @transform_0(%arg0: i32) -> (i32, i32) {
    %c0_i32 = arith.constant 0 : i32
    %c0_i32_0 = arith.constant 0 : i32
    return %arg0, %c0_i32 : i32, i32
  }
  func.func @transform_1(%arg0: i32) -> (i32, i32) {
    %c0_i32 = arith.constant 0 : i32
    %c0_i32_0 = arith.constant 0 : i32
    %c0_i32_1 = arith.constant 0 : i32
    return %c0_i32, %c0_i32_0 : i32, i32
  }
  func.func @transform_2(%arg0: i32) -> (i32, i32) {
    %c0_i32 = arith.constant 0 : i32
    %c0_i32_0 = arith.constant 0 : i32
    %c0_i32_1 = arith.constant 0 : i32
    return %c0_i32, %c0_i32_0 : i32, i32
  }
  func.func @transform_3(%arg0: i32) -> (i32, i32) {
    %c0_i32 = arith.constant 0 : i32
    %c0_i32_0 = arith.constant 0 : i32
    %c0_i32_1 = arith.constant 0 : i32
    return %c0_i32, %c0_i32_0 : i32, i32
  }
  func.func @transform_4(%arg0: i32) -> (i32, i32) {
    %c0_i32 = arith.constant 0 : i32
    %c0_i32_0 = arith.constant 0 : i32
    %c0_i32_1 = arith.constant 0 : i32
    return %c0_i32, %c0_i32_0 : i32, i32
  }
  func.func @transform_5(%arg0: i32) -> (i32, i32) {
    %c0_i32 = arith.constant 0 : i32
    %c0_i32_0 = arith.constant 0 : i32
    %c0_i32_1 = arith.constant 0 : i32
    return %c0_i32, %c0_i32_0 : i32, i32
  }
  func.func @transform_6(%arg0: i32) -> (i32, i32) {
    %c0_i32 = arith.constant 0 : i32
    %c0_i32_0 = arith.constant 0 : i32
    %c0_i32_1 = arith.constant 0 : i32
    return %c0_i32, %c0_i32_0 : i32, i32
  }
  func.func @transform_7(%arg0: i32) -> (i32, i32) {
    %c0_i32 = arith.constant 0 : i32
    %c0_i32_0 = arith.constant 0 : i32
    %c0_i32_1 = arith.constant 0 : i32
    return %c0_i32, %c0_i32_0 : i32, i32
  }
  func.func @transform_8(%arg0: i32) -> (i32, i32) {
    %c0_i32 = arith.constant 0 : i32
    %c0_i32_0 = arith.constant 0 : i32
    %c0_i32_1 = arith.constant 0 : i32
    return %c0_i32, %c0_i32_0 : i32, i32
  }
  func.func @transform_9(%arg0: i32) -> (i32, i32) {
    %c0_i32 = arith.constant 0 : i32
    %c0_i32_0 = arith.constant 0 : i32
    return %arg0, %c0_i32 : i32, i32
  }
}

</mosaic_0001>

<bundles_post_ra>
// kernel: tpu_custom_call.1
= control target key start
LH: loop header
LB: loop body
LE: loop exit
PB: predicated region body
PF: predicated region fallthrough
CT: control target
= control target key end

     0   :  { %vm244_vm0 = vcmask 1042432   ;;  %vm245_vm1 = vcmask 1043456   ;;  %v1832_v1 = vmov 65535   ;;  %vm147_vm2 = vcmask 187392   ;;  %s2774_s1 = inlined_call_operand.vmem [shape: bf16[23,64], index: 1, kind: input, shape index: {}]   ;;  %s2775_s2 = inlined_call_operand.vmem [shape: f32[1,64], index: 2, kind: input, shape index: {}]   ;;  %s2776_s0 = inlined_call_operand.vmem [shape: f32[512,23], index: 0, kind: input, shape index: {}]   ;;  %s2777_s3 = inlined_call_operand.vmem [shape: bf16[64,32], index: 3, kind: input, shape index: {}]   ;;  %s2778_s4 = inlined_call_operand.vmem [shape: f32[1,32], index: 4, kind: input, shape index: {}]   ;;  %s2779_s5 = inlined_call_operand.vmem [shape: bf16[32,32], index: 5, kind: input, shape index: {}]   ;;  %s2780_s6 = inlined_call_operand.vmem [shape: f32[1,32], index: 6, kind: input, shape index: {}]   ;;  %s2781_s7 = inlined_call_operand.vmem [shape: bf16[32,1], index: 7, kind: input, shape index: {}]   ;;  %s2782_s8 = inlined_call_operand.<no memory space> [shape: f32[1,1], index: 8, kind: input, shape index: {}]   ;;  %s2783_s9 = inlined_call_operand.vmem [shape: f32[512,1], index: 9, kind: output, shape index: {}]  }
   0x1   :  { %v133_v0 = vld [vmem:[%s2774_s1 + $0x8] sm:$0xf]  ;;  %v246_v2 = vsel %vm244_vm0, 4294967295, %v1832_v1  ;;  %v1814_v7 = vld [vmem:[%s2774_s1] sm:$0xff]  ;;  %v37_v11 = vld [vmem:[%s2776_s0 + $0x10] sm:$0xff]  ;;  %vm552_vm3 = vcmask 523264  }
   0x2   :  { %v143_v3 = vunpack.c.l.b16 %v133_v0  ;;  %v247_v4 = vsel %vm245_vm1, %v246_v2, 0  ;;  %v35_v8 = vld [vmem:[%s2776_s0] sm:$0xff]  ;;  %v36_v9 = vld [vmem:[%s2776_s0 + $0x8] sm:$0xff]  ;;  %v38_v12 = vld [vmem:[%s2776_s0 + $0x18] sm:$0xff]  ;;  %vm934_vm4 = vcmask 261120   ;;  %vm1581_vm5 = vcmask 7168  }
   0x3   :  { %v99_v10 = vpack.c.bf16 %v36_v9, %v35_v8  ;;  %v100_v13 = vpack.c.bf16 %v38_v12, %v37_v11  ;;  %v39_v14 = vld [vmem:[%s2776_s0 + $0x20] sm:$0xff]  ;;  %v40_v15 = vld [vmem:[%s2776_s0 + $0x28] sm:$0xff]  ;;  %v41_v17 = vld [vmem:[%s2776_s0 + $0x30] sm:$0xff] }
   0x4   :  { %v145_v5 = vpack.c.b16 %v143_v3, %v143_v3  ;;  %v101_v16 = vpack.c.bf16 %v40_v15, %v39_v14  ;;  %v42_v18 = vld [vmem:[%s2776_s0 + $0x38] sm:$0xff]  ;;  %v43_v20 = vld [vmem:[%s2776_s0 + $0x40] sm:$0xff]  ;;  %v44_v21 = vld [vmem:[%s2776_s0 + $0x48] sm:$0xff] }
   0x5   :  { %v102_v19 = vpack.c.bf16 %v42_v18, %v41_v17  ;;  %v103_v22 = vpack.c.bf16 %v44_v21, %v43_v20  ;;  %v45_v23 = vld [vmem:[%s2776_s0 + $0x50] sm:$0xff]  ;;  %v46_v24 = vld [vmem:[%s2776_s0 + $0x58] sm:$0xff]  ;;  %v47_v26 = vld [vmem:[%s2776_s0 + $0x60] sm:$0xff] }
   0x6   :  { %v249_v6 = vand.u32 %v247_v4, %v145_v5  ;;  %v104_v25 = vpack.c.bf16 %v46_v24, %v45_v23  ;;  %v48_v27 = vld [vmem:[%s2776_s0 + $0x68] sm:$0xff]  ;;  %v1818_v28 = vld [vmem:[%s2777_s3 + $0x18] sm:$0xff]  ;;  %v1817_v30 = vld [vmem:[%s2777_s3 + $0x10] sm:$0xff] }
   0x7   :  { %v105_v29 = vpack.c.bf16 %v48_v27, %v47_v26  ;;  %653 = vmatpush.bf16.msra.mxu1 %v1818_v28  ;;  %v1816_v31 = vld [vmem:[%s2777_s3 + $0x8] sm:$0xff]  ;;  %v1815_v32 = vld [vmem:[%s2777_s3] sm:$0xff]  ;;  %v49_v33 = vld [vmem:[%s2776_s0 + $0x70] sm:$0xff] }
   0x8   :  { %257 = vmatpush.bf16.msra.mxu0 %v249_v6  ;;  %v50_v34 = vld [vmem:[%s2776_s0 + $0x78] sm:$0xff]  ;;  %v51_v36 = vld [vmem:[%s2776_s0 + $0x80] sm:$0xff]  ;;  %v52_v37 = vld [vmem:[%s2776_s0 + $0x88] sm:$0xff] }
   0x9   :  { %v106_v35 = vpack.c.bf16 %v50_v34, %v49_v33  ;;  %v107_v38 = vpack.c.bf16 %v52_v37, %v51_v36  ;;  %v1966_v40 = vld [vmem:[%s2775_s2] ss:$0 sm:$0xff]  ;;  %v53_v46 = vld [vmem:[%s2776_s0 + $0x90] sm:$0xff]  ;;  %v54_v47 = vld [vmem:[%s2776_s0 + $0x98] sm:$0xff] }
   0xa   :  { %v108_v49 = vpack.c.bf16 %v54_v47, %v53_v46  ;;  %v55_v56 = vld [vmem:[%s2776_s0 + $0xa0] sm:$0xff]  ;;  %v56_v57 = vld [vmem:[%s2776_s0 + $0xa8] sm:$0xff]  ;;  %v57_v2 = vld [vmem:[%s2776_s0 + $0xb0] sm:$0xff] }
   0xb   :  { %654 = vmatpush.bf16.msra.mxu1 %v1817_v30  ;;  %v109_v59 = vpack.c.bf16 %v56_v57, %v55_v56  ;;  %v58_v3 = vld [vmem:[%s2776_s0 + $0xb8] sm:$0xff]  ;;  %v59_v12 = vld [vmem:[%s2776_s0 + $0xc0] sm:$0xff]  ;;  %v64_v33 = vld [vmem:[%s2776_s0 + $0xe8] sm:$0xff] }
   0xc   :  { %258 = vmatpush.bf16.msra.mxu0 %v1814_v7  ;;  %v110_v5 = vpack.c.bf16 %v58_v3, %v57_v2  ;;  %v62_v23 = vld [vmem:[%s2776_s0 + $0xd8] sm:$0xff]  ;;  %v68_v56 = vld [vmem:[%s2776_s0 + $0x108] sm:$0xff]  ;;  %v69_v2 = vld [vmem:[%s2776_s0 + $0x110] sm:$0xff] }
   0xd   :  { %v70_v3 = vld [vmem:[%s2776_s0 + $0x118] sm:$0xff] }
   0xf   :  { %1654 = vmatmul.msk.bf16.vlgmr.msra.gmra.mxu0 %vm147_vm2, %v99_v10  ;;  %655 = vmatpush.bf16.msra.mxu1 %v1816_v31 }
  0x13   :  { %656 = vmatpush.bf16.msra.mxu1 %v1815_v32  ;;  %v63_v32 = vld [vmem:[%s2776_s0 + $0xe0] sm:$0xff] }
  0x1f   :  { %1655 = vmatmul.msk.bf16.gmra.mxu0 %vm147_vm2, %v100_v13  ;;  %v60_v13 = vld [vmem:[%s2776_s0 + $0xc8] sm:$0xff] }
  0x20   :  { %v111_v15 = vpack.c.bf16 %v60_v13, %v59_v12 }
  0x2f   :  { %1656 = vmatmul.msk.bf16.gmra.mxu0 %vm147_vm2, %v101_v16 }
  0x3f   :  { %1657 = vmatmul.msk.bf16.gmra.mxu0 %vm147_vm2, %v102_v19 }
  0x4f   :  { %1658 = vmatmul.msk.bf16.gmra.mxu0 %vm147_vm2, %v103_v22  ;;  %v61_v22 = vld [vmem:[%s2776_s0 + $0xd0] sm:$0xff] }
  0x5f   :  { %1659 = vmatmul.msk.bf16.gmra.mxu0 %vm147_vm2, %v104_v25  ;;  %v112_v25 = vpack.c.bf16 %v62_v23, %v61_v22 }
  0x6f   :  { %1660 = vmatmul.msk.bf16.gmra.mxu0 %vm147_vm2, %v105_v29 }
  0x7f   :  { %1661 = vmatmul.msk.bf16.gmra.mxu0 %vm147_vm2, %v106_v35  ;;  %v113_v35 = vpack.c.bf16 %v64_v33, %v63_v32 }
  0x8c   :  { %v260_v39 = vpop.f32.mrf.mxu0 }
  0x8d   :  { %v261_v41 = vadd.f32 %v1966_v40, %v260_v39 }
  0x8f   :  { %1662 = vmatmul.msk.bf16.gmra.mxu0 %vm147_vm2, %v107_v38  ;;  %v420_v44 = vmax.f32 %v261_v41, 0.0 }
  0x94   :  { %v262_v42 = vpop.f32.mrf.mxu0 }
  0x95   :  { %v263_v43 = vadd.f32 %v1966_v40, %v262_v42 }
  0x97   :  { %v421_v45 = vmax.f32 %v263_v43, 0.0  ;;  %v65_v43 = vld [vmem:[%s2776_s0 + $0xf0] sm:$0xff] }
  0x99   :  { %v484_v48 = vpack.c.bf16 %v421_v45, %v420_v44  ;;  %v66_v44 = vld [vmem:[%s2776_s0 + $0xf8] sm:$0xff] }
  0x9a   :  { %v114_v46 = vpack.c.bf16 %v66_v44, %v65_v43 }
  0x9b   :  { %1702 = vmatmul.msk.bf16.vlgmr.msra.gmra.mxu1 %vm552_vm3, %v484_v48  ;;  %v1820_v48 = vld [vmem:[%s2779_s5 + $0x8] sm:$0xff] }
  0x9c   :  { %v265_v50 = vpop.f32.mrf.mxu0  ;;  %1037 = vmatpush.bf16.msra.mxu2 %v1820_v48 }
  0x9d   :  { %v266_v51 = vadd.f32 %v1966_v40, %v265_v50 }
  0x9f   :  { %1663 = vmatmul.msk.bf16.gmra.mxu0 %vm147_vm2, %v108_v49  ;;  %v422_v54 = vmax.f32 %v266_v51, 0.0  ;;  %v1819_v49 = vld [vmem:[%s2779_s5] sm:$0xff] }
  0xa0   :  { %1038 = vmatpush.bf16.msra.mxu2 %v1819_v49 }
  0xa4   :  { %v267_v52 = vpop.f32.mrf.mxu0 }
  0xa5   :  { %v268_v53 = vadd.f32 %v1966_v40, %v267_v52 }
  0xa7   :  { %v423_v55 = vmax.f32 %v268_v53, 0.0 }
  0xa9   :  { %v485_v58 = vpack.c.bf16 %v423_v55, %v422_v54  ;;  %v67_v55 = vld [vmem:[%s2776_s0 + $0x100] sm:$0xff] }
  0xab   :  { %1703 = vmatmul.msk.bf16.gmra.mxu1 %vm552_vm3, %v485_v58  ;;  %v115_v58 = vpack.c.bf16 %v68_v56, %v67_v55  ;;  %v75_v55 = vld [vmem:[%s2776_s0 + $0x140] sm:$0xff]  ;;  %v76_v56 = vld [vmem:[%s2776_s0 + $0x148] sm:$0xff] }
  0xac   :  { %v270_v60 = vpop.f32.mrf.mxu0 }
  0xad   :  { %v271_v61 = vadd.f32 %v1966_v40, %v270_v60 }
  0xaf   :  { %1664 = vmatmul.msk.bf16.gmra.mxu0 %vm147_vm2, %v109_v59  ;;  %v424_v0 = vmax.f32 %v271_v61, 0.0 }
  0xb4   :  { %v272_v62 = vpop.f32.mrf.mxu0 }
  0xb5   :  { %v273_v63 = vadd.f32 %v1966_v40, %v272_v62 }
  0xb7   :  { %v425_v1 = vmax.f32 %v273_v63, 0.0 }
  0xb9   :  { %v486_v4 = vpack.c.bf16 %v425_v1, %v424_v0 }
  0xbb   :  { %1704 = vmatmul.msk.bf16.gmra.mxu1 %vm552_vm3, %v486_v4 }
  0xbc   :  { %v275_v6 = vpop.f32.mrf.mxu0 }
  0xbd   :  { %v276_v7 = vadd.f32 %v1966_v40, %v275_v6  ;;  %v116_v6 = vpack.c.bf16 %v70_v3, %v69_v2 }
  0xbf   :  { %1665 = vmatmul.msk.bf16.gmra.mxu0 %vm147_vm2, %v110_v5  ;;  %v426_v10 = vmax.f32 %v276_v7, 0.0  ;;  %v2066_v5 = vld [vmem:[%s2778_s4] ss:$0 sm:$0xff] }
  0xc4   :  { %v277_v8 = vpop.f32.mrf.mxu0 }
  0xc5   :  { %v278_v9 = vadd.f32 %v1966_v40, %v277_v8 }
  0xc7   :  { %v427_v11 = vmax.f32 %v278_v9, 0.0 }
  0xc9   :  { %v487_v14 = vpack.c.bf16 %v427_v11, %v426_v10 }
  0xcb   :  { %1705 = vmatmul.msk.bf16.gmra.mxu1 %vm552_vm3, %v487_v14 }
  0xcc   :  { %v280_v16 = vpop.f32.mrf.mxu0 }
  0xcd   :  { %v281_v17 = vadd.f32 %v1966_v40, %v280_v16 }
  0xcf   :  { %1666 = vmatmul.msk.bf16.gmra.mxu0 %vm147_vm2, %v111_v15  ;;  %v428_v20 = vmax.f32 %v281_v17, 0.0 }
  0xd4   :  { %v282_v18 = vpop.f32.mrf.mxu0 }
  0xd5   :  { %v283_v19 = vadd.f32 %v1966_v40, %v282_v18 }
  0xd7   :  { %v429_v21 = vmax.f32 %v283_v19, 0.0 }
  0xd9   :  { %v488_v24 = vpack.c.bf16 %v429_v21, %v428_v20  ;;  %v71_v20 = vld [vmem:[%s2776_s0 + $0x120] sm:$0xff]  ;;  %v72_v21 = vld [vmem:[%s2776_s0 + $0x128] sm:$0xff] }
  0xda   :  { %v117_v23 = vpack.c.bf16 %v72_v21, %v71_v20 }
  0xdb   :  { %1706 = vmatmul.msk.bf16.gmra.mxu1 %vm552_vm3, %v488_v24 }
  0xdc   :  { %v285_v26 = vpop.f32.mrf.mxu0 }
  0xdd   :  { %v286_v27 = vadd.f32 %v1966_v40, %v285_v26 }
  0xdf   :  { %1667 = vmatmul.msk.bf16.gmra.mxu0 %vm147_vm2, %v112_v25  ;;  %v430_v30 = vmax.f32 %v286_v27, 0.0 }
  0xe4   :  { %v287_v28 = vpop.f32.mrf.mxu0 }
  0xe5   :  { %v288_v29 = vadd.f32 %v1966_v40, %v287_v28 }
  0xe7   :  { %v431_v31 = vmax.f32 %v288_v29, 0.0 }
  0xe9   :  { %v489_v34 = vpack.c.bf16 %v431_v31, %v430_v30 }
  0xeb   :  { %1707 = vmatmul.msk.bf16.gmra.mxu1 %vm552_vm3, %v489_v34 }
  0xec   :  { %v290_v36 = vpop.f32.mrf.mxu0 }
  0xed   :  { %v291_v37 = vadd.f32 %v1966_v40, %v290_v36 }
  0xef   :  { %1668 = vmatmul.msk.bf16.gmra.mxu0 %vm147_vm2, %v113_v35  ;;  %v432_v41 = vmax.f32 %v291_v37, 0.0  ;;  %v73_v37 = vld [vmem:[%s2776_s0 + $0x130] sm:$0xff] }
  0xf4   :  { %v292_v38 = vpop.f32.mrf.mxu0 }
  0xf5   :  { %v293_v39 = vadd.f32 %v1966_v40, %v292_v38  ;;  %v74_v38 = vld [vmem:[%s2776_s0 + $0x138] sm:$0xff] }
  0xf7   :  { %v433_v42 = vmax.f32 %v293_v39, 0.0 }
  0xf9   :  { %v490_v45 = vpack.c.bf16 %v433_v42, %v432_v41  ;;  %v118_v41 = vpack.c.bf16 %v74_v38, %v73_v37 }
  0xfb   :  { %1708 = vmatmul.msk.bf16.gmra.mxu1 %vm552_vm3, %v490_v45 }
  0xfc   :  { %v295_v47 = vpop.f32.mrf.mxu0 }
  0xfd   :  { %v296_v50 = vadd.f32 %v1966_v40, %v295_v47 }
  0xff   :  { %1669 = vmatmul.msk.bf16.gmra.mxu0 %vm147_vm2, %v114_v46  ;;  %v434_v53 = vmax.f32 %v296_v50, 0.0 }
 0x104   :  { %v297_v51 = vpop.f32.mrf.mxu0 }
 0x105   :  { %v298_v52 = vadd.f32 %v1966_v40, %v297_v51 }
 0x107   :  { %v435_v54 = vmax.f32 %v298_v52, 0.0 }
 0x109   :  { %v491_v57 = vpack.c.bf16 %v435_v54, %v434_v53 }
 0x10b   :  { %1709 = vmatmul.msk.bf16.gmra.mxu1 %vm552_vm3, %v491_v57 }
 0x10c   :  { %v300_v59 = vpop.f32.mrf.mxu0 }
 0x10d   :  { %v301_v60 = vadd.f32 %v1966_v40, %v300_v59 }
 0x10f   :  { %1670 = vmatmul.msk.bf16.gmra.mxu0 %vm147_vm2, %v115_v58  ;;  %v436_v63 = vmax.f32 %v301_v60, 0.0  ;;  %v119_v58 = vpack.c.bf16 %v76_v56, %v75_v55 }
 0x114   :  { %v302_v61 = vpop.f32.mrf.mxu0 }
 0x115   :  { %v303_v62 = vadd.f32 %v1966_v40, %v302_v61 }
 0x117   :  { %v437_v0 = vmax.f32 %v303_v62, 0.0 }
 0x118   :  { %v658_v1 = vpop.f32.mrf.mxu1 }
 0x119   :  { %v492_v4 = vpack.c.bf16 %v437_v0, %v436_v63  ;;  %v659_v8 = vadd.f32 %v2066_v5, %v658_v1 }
 0x11b   :  { %1710 = vmatmul.msk.bf16.gmra.mxu1 %vm552_vm3, %v492_v4  ;;  %v818_v11 = vmax.f32 %v659_v8, 0.0 }
 0x11c   :  { %v305_v7 = vpop.f32.mrf.mxu0 }
 0x11d   :  { %v306_v12 = vadd.f32 %v1966_v40, %v305_v7 }
 0x11f   :  { %1671 = vmatmul.msk.bf16.gmra.mxu0 %vm147_vm2, %v116_v6  ;;  %v438_v17 = vmax.f32 %v306_v12, 0.0 }
 0x120   :  { %v660_v9 = vpop.f32.mrf.mxu1 }
 0x121   :  { %v661_v10 = vadd.f32 %v2066_v5, %v660_v9  ;;  %v77_v9 = vld [vmem:[%s2776_s0 + $0x150] sm:$0xff] }
 0x123   :  { %v819_v13 = vmax.f32 %v661_v10, 0.0  ;;  %v78_v10 = vld [vmem:[%s2776_s0 + $0x158] sm:$0xff] }
 0x124   :  { %v307_v14 = vpop.f32.mrf.mxu0  ;;  %v120_v12 = vpack.c.bf16 %v78_v10, %v77_v9 }
 0x125   :  { %v308_v15 = vadd.f32 %v1966_v40, %v307_v14  ;;  %v882_v16 = vpack.c.bf16 %v819_v13, %v818_v11 }
 0x127   :  { %v439_v18 = vmax.f32 %v308_v15, 0.0  ;;  %1742 = vmatmul.msk.bf16.vlgmr.msra.gmra.mxu2 %vm934_vm4, %v882_v16 }
 0x128   :  { %v663_v19 = vpop.f32.mrf.mxu1 }
 0x129   :  { %v493_v22 = vpack.c.bf16 %v439_v18, %v438_v17  ;;  %v664_v25 = vadd.f32 %v2066_v5, %v663_v19 }
 0x12b   :  { %1711 = vmatmul.msk.bf16.gmra.mxu1 %vm552_vm3, %v493_v22  ;;  %v820_v28 = vmax.f32 %v664_v25, 0.0 }
 0x12c   :  { %v310_v24 = vpop.f32.mrf.mxu0 }
 0x12d   :  { %v311_v29 = vadd.f32 %v1966_v40, %v310_v24 }
 0x12f   :  { %1672 = vmatmul.msk.bf16.gmra.mxu0 %vm147_vm2, %v117_v23  ;;  %v440_v34 = vmax.f32 %v311_v29, 0.0 }
 0x130   :  { %v665_v26 = vpop.f32.mrf.mxu1 }
 0x131   :  { %v666_v27 = vadd.f32 %v2066_v5, %v665_v26  ;;  %v79_v26 = vld [vmem:[%s2776_s0 + $0x160] sm:$0xff] }
 0x133   :  { %v821_v30 = vmax.f32 %v666_v27, 0.0  ;;  %v80_v27 = vld [vmem:[%s2776_s0 + $0x168] sm:$0xff] }
 0x134   :  { %v312_v31 = vpop.f32.mrf.mxu0  ;;  %v121_v29 = vpack.c.bf16 %v80_v27, %v79_v26 }
 0x135   :  { %v313_v32 = vadd.f32 %v1966_v40, %v312_v31  ;;  %v883_v33 = vpack.c.bf16 %v821_v30, %v820_v28 }
 0x137   :  { %v441_v35 = vmax.f32 %v313_v32, 0.0  ;;  %1743 = vmatmul.msk.bf16.gmra.mxu2 %vm934_vm4, %v883_v33 }
 0x138   :  { %v668_v36 = vpop.f32.mrf.mxu1 }
 0x139   :  { %v494_v39 = vpack.c.bf16 %v441_v35, %v440_v34  ;;  %v669_v43 = vadd.f32 %v2066_v5, %v668_v36 }
 0x13b   :  { %1712 = vmatmul.msk.bf16.gmra.mxu1 %vm552_vm3, %v494_v39  ;;  %v822_v46 = vmax.f32 %v669_v43, 0.0 }
 0x13c   :  { %v315_v42 = vpop.f32.mrf.mxu0 }
 0x13d   :  { %v316_v47 = vadd.f32 %v1966_v40, %v315_v42 }
 0x13f   :  { %1673 = vmatmul.msk.bf16.gmra.mxu0 %vm147_vm2, %v118_v41  ;;  %v442_v52 = vmax.f32 %v316_v47, 0.0 }
 0x140   :  { %v670_v44 = vpop.f32.mrf.mxu1 }
 0x141   :  { %v671_v45 = vadd.f32 %v2066_v5, %v670_v44  ;;  %v81_v44 = vld [vmem:[%s2776_s0 + $0x170] sm:$0xff] }
 0x143   :  { %v823_v48 = vmax.f32 %v671_v45, 0.0  ;;  %v82_v45 = vld [vmem:[%s2776_s0 + $0x178] sm:$0xff] }
 0x144   :  { %v317_v49 = vpop.f32.mrf.mxu0  ;;  %v122_v47 = vpack.c.bf16 %v82_v45, %v81_v44 }
 0x145   :  { %v318_v50 = vadd.f32 %v1966_v40, %v317_v49  ;;  %v884_v51 = vpack.c.bf16 %v823_v48, %v822_v46 }
 0x147   :  { %v443_v53 = vmax.f32 %v318_v50, 0.0  ;;  %1744 = vmatmul.msk.bf16.gmra.mxu2 %vm934_vm4, %v884_v51 }
 0x148   :  { %v673_v54 = vpop.f32.mrf.mxu1 }
 0x149   :  { %v495_v57 = vpack.c.bf16 %v443_v53, %v442_v52  ;;  %v674_v60 = vadd.f32 %v2066_v5, %v673_v54 }
 0x14b   :  { %1713 = vmatmul.msk.bf16.gmra.mxu1 %vm552_vm3, %v495_v57  ;;  %v824_v63 = vmax.f32 %v674_v60, 0.0 }
 0x14c   :  { %v320_v59 = vpop.f32.mrf.mxu0 }
 0x14d   :  { %v321_v0 = vadd.f32 %v1966_v40, %v320_v59 }
 0x14f   :  { %1674 = vmatmul.msk.bf16.gmra.mxu0 %vm147_vm2, %v119_v58  ;;  %v444_v6 = vmax.f32 %v321_v0, 0.0 }
 0x150   :  { %v675_v61 = vpop.f32.mrf.mxu1 }
 0x151   :  { %v676_v62 = vadd.f32 %v2066_v5, %v675_v61  ;;  %v83_v61 = vld [vmem:[%s2776_s0 + $0x180] sm:$0xff] }
 0x153   :  { %v825_v1 = vmax.f32 %v676_v62, 0.0  ;;  %v84_v62 = vld [vmem:[%s2776_s0 + $0x188] sm:$0xff] }
 0x154   :  { %v322_v2 = vpop.f32.mrf.mxu0  ;;  %v123_v0 = vpack.c.bf16 %v84_v62, %v83_v61  ;;  %v90_v61 = vld [vmem:[%s2776_s0 + $0x1b8] sm:$0xff] }
 0x155   :  { %v323_v3 = vadd.f32 %v1966_v40, %v322_v2  ;;  %v885_v4 = vpack.c.bf16 %v825_v1, %v824_v63 }
 0x157   :  { %v445_v7 = vmax.f32 %v323_v3, 0.0  ;;  %1745 = vmatmul.msk.bf16.gmra.mxu2 %vm934_vm4, %v885_v4  ;;  %v1822_v4 = vld [vmem:[%s2781_s7 + $0x8] sm:$0xff] }
 0x158   :  { %v678_v8 = vpop.f32.mrf.mxu1  ;;  %1418 = vmatpush.bf16.msra.mxu3 %v1822_v4 }
 0x159   :  { %v496_v11 = vpack.c.bf16 %v445_v7, %v444_v6  ;;  %v679_v14 = vadd.f32 %v2066_v5, %v678_v8 }
 0x15b   :  { %1714 = vmatmul.msk.bf16.gmra.mxu1 %vm552_vm3, %v496_v11  ;;  %v826_v17 = vmax.f32 %v679_v14, 0.0  ;;  %v1821_v11 = vld [vmem:[%s2781_s7] sm:$0xff] }
 0x15c   :  { %v325_v13 = vpop.f32.mrf.mxu0  ;;  %1419 = vmatpush.bf16.msra.mxu3 %v1821_v11 }
 0x15d   :  { %v326_v18 = vadd.f32 %v1966_v40, %v325_v13 }
 0x15f   :  { %1675 = vmatmul.msk.bf16.gmra.mxu0 %vm147_vm2, %v120_v12  ;;  %v446_v23 = vmax.f32 %v326_v18, 0.0  ;;  %v86_v18 = vld [vmem:[%s2776_s0 + $0x198] sm:$0xff] }
 0x160   :  { %v680_v15 = vpop.f32.mrf.mxu1 }
 0x161   :  { %v681_v16 = vadd.f32 %v2066_v5, %v680_v15 }
 0x163   :  { %v827_v19 = vmax.f32 %v681_v16, 0.0 }
 0x164   :  { %v327_v20 = vpop.f32.mrf.mxu0 }
 0x165   :  { %v328_v21 = vadd.f32 %v1966_v40, %v327_v20  ;;  %v886_v22 = vpack.c.bf16 %v827_v19, %v826_v17  ;;  %v85_v17 = vld [vmem:[%s2776_s0 + $0x190] sm:$0xff] }
 0x166   :  { %v124_v20 = vpack.c.bf16 %v86_v18, %v85_v17 }
 0x167   :  { %v447_v24 = vmax.f32 %v328_v21, 0.0  ;;  %1746 = vmatmul.msk.bf16.gmra.mxu2 %vm934_vm4, %v886_v22 }
 0x168   :  { %v683_v25 = vpop.f32.mrf.mxu1 }
 0x169   :  { %v497_v28 = vpack.c.bf16 %v447_v24, %v446_v23  ;;  %v684_v31 = vadd.f32 %v2066_v5, %v683_v25 }
 0x16b   :  { %1715 = vmatmul.msk.bf16.gmra.mxu1 %vm552_vm3, %v497_v28  ;;  %v828_v34 = vmax.f32 %v684_v31, 0.0 }
 0x16c   :  { %v330_v30 = vpop.f32.mrf.mxu0 }
 0x16d   :  { %v331_v35 = vadd.f32 %v1966_v40, %v330_v30 }
 0x16f   :  { %1676 = vmatmul.msk.bf16.gmra.mxu0 %vm147_vm2, %v121_v29  ;;  %v448_v41 = vmax.f32 %v331_v35, 0.0  ;;  %v88_v35 = vld [vmem:[%s2776_s0 + $0x1a8] sm:$0xff] }
 0x170   :  { %v685_v32 = vpop.f32.mrf.mxu1 }
 0x171   :  { %v686_v33 = vadd.f32 %v2066_v5, %v685_v32 }
 0x173   :  { %v829_v36 = vmax.f32 %v686_v33, 0.0 }
 0x174   :  { %v332_v37 = vpop.f32.mrf.mxu0 }
 0x175   :  { %v333_v38 = vadd.f32 %v1966_v40, %v332_v37  ;;  %v887_v39 = vpack.c.bf16 %v829_v36, %v828_v34  ;;  %v87_v34 = vld [vmem:[%s2776_s0 + $0x1a0] sm:$0xff] }
 0x177   :  { %v449_v42 = vmax.f32 %v333_v38, 0.0  ;;  %1747 = vmatmul.msk.bf16.gmra.mxu2 %vm934_vm4, %v887_v39  ;;  %v125_v38 = vpack.c.bf16 %v88_v35, %v87_v34 }
 0x178   :  { %v688_v43 = vpop.f32.mrf.mxu1 }
 0x179   :  { %v498_v46 = vpack.c.bf16 %v449_v42, %v448_v41  ;;  %v689_v49 = vadd.f32 %v2066_v5, %v688_v43  ;;  %v2195_v41 = vld [vmem:[%s2780_s6] ss:$0 sm:$0xff] }
 0x17b   :  { %1716 = vmatmul.msk.bf16.gmra.mxu1 %vm552_vm3, %v498_v46  ;;  %v830_v52 = vmax.f32 %v689_v49, 0.0 }
 0x17c   :  { %v335_v48 = vpop.f32.mrf.mxu0 }
 0x17d   :  { %v336_v53 = vadd.f32 %v1966_v40, %v335_v48 }
 0x17f   :  { %1677 = vmatmul.msk.bf16.gmra.mxu0 %vm147_vm2, %v122_v47  ;;  %v450_v58 = vmax.f32 %v336_v53, 0.0 }
 0x180   :  { %v690_v50 = vpop.f32.mrf.mxu1 }
 0x181   :  { %v691_v51 = vadd.f32 %v2066_v5, %v690_v50 }
 0x183   :  { %v831_v54 = vmax.f32 %v691_v51, 0.0 }
 0x184   :  { %v337_v55 = vpop.f32.mrf.mxu0 }
 0x185   :  { %v338_v56 = vadd.f32 %v1966_v40, %v337_v55  ;;  %v888_v57 = vpack.c.bf16 %v831_v54, %v830_v52 }
 0x187   :  { %v451_v59 = vmax.f32 %v338_v56, 0.0  ;;  %1748 = vmatmul.msk.bf16.gmra.mxu2 %vm934_vm4, %v888_v57 }
 0x188   :  { %v693_v60 = vpop.f32.mrf.mxu1 }
 0x189   :  { %v499_v63 = vpack.c.bf16 %v451_v59, %v450_v58  ;;  %v694_v2 = vadd.f32 %v2066_v5, %v693_v60  ;;  %v89_v60 = vld [vmem:[%s2776_s0 + $0x1b0] sm:$0xff] }
 0x18b   :  { %1717 = vmatmul.msk.bf16.gmra.mxu1 %vm552_vm3, %v499_v63  ;;  %v832_v7 = vmax.f32 %v694_v2, 0.0 }
 0x18c   :  { %v340_v1 = vpop.f32.mrf.mxu0 }
 0x18d   :  { %v341_v8 = vadd.f32 %v1966_v40, %v340_v1 }
 0x18f   :  { %1678 = vmatmul.msk.bf16.gmra.mxu0 %vm147_vm2, %v123_v0  ;;  %v452_v14 = vmax.f32 %v341_v8, 0.0  ;;  %v126_v0 = vpack.c.bf16 %v90_v61, %v89_v60 }
 0x190   :  { %v695_v3 = vpop.f32.mrf.mxu1 }
 0x191   :  { %v696_v6 = vadd.f32 %v2066_v5, %v695_v3 }
 0x193   :  { %v833_v9 = vmax.f32 %v696_v6, 0.0 }
 0x194   :  { %v342_v10 = vpop.f32.mrf.mxu0 }
 0x195   :  { %v343_v12 = vadd.f32 %v1966_v40, %v342_v10  ;;  %v889_v13 = vpack.c.bf16 %v833_v9, %v832_v7 }
 0x197   :  { %v453_v15 = vmax.f32 %v343_v12, 0.0  ;;  %1749 = vmatmul.msk.bf16.gmra.mxu2 %vm934_vm4, %v889_v13 }
 0x198   :  { %v698_v16 = vpop.f32.mrf.mxu1 }
 0x199   :  { %v500_v19 = vpack.c.bf16 %v453_v15, %v452_v14  ;;  %v699_v22 = vadd.f32 %v2066_v5, %v698_v16 }
 0x19b   :  { %1718 = vmatmul.msk.bf16.gmra.mxu1 %vm552_vm3, %v500_v19  ;;  %v834_v25 = vmax.f32 %v699_v22, 0.0  ;;  %v92_v22 = vld [vmem:[%s2776_s0 + $0x1c8] sm:$0xff] }
 0x19c   :  { %v345_v21 = vpop.f32.mrf.mxu0 }
 0x19d   :  { %v346_v26 = vadd.f32 %v1966_v40, %v345_v21  ;;  %v91_v21 = vld [vmem:[%s2776_s0 + $0x1c0] sm:$0xff] }
 0x19f   :  { %1679 = vmatmul.msk.bf16.gmra.mxu0 %vm147_vm2, %v124_v20  ;;  %v454_v31 = vmax.f32 %v346_v26, 0.0 }
 0x1a0   :  { %v700_v23 = vpop.f32.mrf.mxu1 }
 0x1a1   :  { %v701_v24 = vadd.f32 %v2066_v5, %v700_v23 }
 0x1a3   :  { %v835_v27 = vmax.f32 %v701_v24, 0.0 }
 0x1a4   :  { %v347_v28 = vpop.f32.mrf.mxu0 }
 0x1a5   :  { %v348_v29 = vadd.f32 %v1966_v40, %v347_v28  ;;  %v890_v30 = vpack.c.bf16 %v835_v27, %v834_v25  ;;  %v127_v25 = vpack.c.bf16 %v92_v22, %v91_v21 }
 0x1a7   :  { %v455_v32 = vmax.f32 %v348_v29, 0.0  ;;  %1750 = vmatmul.msk.bf16.gmra.mxu2 %vm934_vm4, %v890_v30 }
 0x1a8   :  { %v703_v33 = vpop.f32.mrf.mxu1 }
 0x1a9   :  { %v501_v36 = vpack.c.bf16 %v455_v32, %v454_v31  ;;  %v704_v42 = vadd.f32 %v2066_v5, %v703_v33 }
 0x1aa   :  { %v1040_v37 = vpop.f32.mrf.mxu2 }
 0x1ab   :  { %1719 = vmatmul.msk.bf16.gmra.mxu1 %vm552_vm3, %v501_v36  ;;  %v1041_v44 = vadd.f32 %v2195_v41, %v1040_v37  ;;  %v836_v47 = vmax.f32 %v704_v42, 0.0 }
 0x1ac   :  { %v350_v39 = vpop.f32.mrf.mxu0 }
 0x1ad   :  { %v351_v48 = vadd.f32 %v1966_v40, %v350_v39  ;;  %v1200_v52 = vmax.f32 %v1041_v44, 0.0 }
 0x1af   :  { %1680 = vmatmul.msk.bf16.gmra.mxu0 %vm147_vm2, %v125_v38  ;;  %v456_v56 = vmax.f32 %v351_v48, 0.0  ;;  %v94_v48 = vld [vmem:[%s2776_s0 + $0x1d8] sm:$0xff] }
 0x1b0   :  { %v705_v43 = vpop.f32.mrf.mxu1 }
 0x1b1   :  { %v706_v45 = vadd.f32 %v2066_v5, %v705_v43 }
 0x1b2   :  { %v1042_v46 = vpop.f32.mrf.mxu2 }
 0x1b3   :  { %v837_v49 = vmax.f32 %v706_v45, 0.0  ;;  %v1043_v50 = vadd.f32 %v2195_v41, %v1042_v46 }
 0x1b4   :  { %v352_v51 = vpop.f32.mrf.mxu0 }
 0x1b5   :  { %v1201_v53 = vmax.f32 %v1043_v50, 0.0  ;;  %v353_v54 = vadd.f32 %v1966_v40, %v352_v51  ;;  %v891_v55 = vpack.c.bf16 %v837_v49, %v836_v47  ;;  %v93_v47 = vld [vmem:[%s2776_s0 + $0x1d0] sm:$0xff] }
 0x1b6   :  { %v128_v51 = vpack.c.bf16 %v94_v48, %v93_v47 }
 0x1b7   :  { %v457_v57 = vmax.f32 %v353_v54, 0.0  ;;  %1751 = vmatmul.msk.bf16.gmra.mxu2 %vm934_vm4, %v891_v55  ;;  %v1264_v58 = vpack.c.bf16 %v1201_v53, %v1200_v52 }
 0x1b8   :  { %v708_v59 = vpop.f32.mrf.mxu1 }
 0x1b9   :  { %v502_v62 = vpack.c.bf16 %v457_v57, %v456_v56  ;;  %1782 = vmatmul.msk.bf16.vlgmr.msra.gmra.mxu3 %vm934_vm4, %v1264_v58  ;;  %v709_v2 = vadd.f32 %v2066_v5, %v708_v59 }
 0x1ba   :  { %v1045_v63 = vpop.f32.mrf.mxu2 }
 0x1bb   :  { %1720 = vmatmul.msk.bf16.gmra.mxu1 %vm552_vm3, %v502_v62  ;;  %v1046_v4 = vadd.f32 %v2195_v41, %v1045_v63  ;;  %v838_v8 = vmax.f32 %v709_v2, 0.0 }
 0x1bc   :  { %v355_v1 = vpop.f32.mrf.mxu0 }
 0x1bd   :  { %v356_v9 = vadd.f32 %v1966_v40, %v355_v1  ;;  %v1202_v13 = vmax.f32 %v1046_v4, 0.0 }
 0x1bf   :  { %1681 = vmatmul.msk.bf16.gmra.mxu0 %vm147_vm2, %v126_v0  ;;  %v458_v17 = vmax.f32 %v356_v9, 0.0  ;;  %v96_v9 = vld [vmem:[%s2776_s0 + $0x1e8] sm:$0xff] }
 0x1c0   :  { %v710_v3 = vpop.f32.mrf.mxu1 }
 0x1c1   :  { %v711_v6 = vadd.f32 %v2066_v5, %v710_v3 }
 0x1c2   :  { %v1047_v7 = vpop.f32.mrf.mxu2 }
 0x1c3   :  { %v839_v10 = vmax.f32 %v711_v6, 0.0  ;;  %v1048_v11 = vadd.f32 %v2195_v41, %v1047_v7 }
 0x1c4   :  { %v357_v12 = vpop.f32.mrf.mxu0 }
 0x1c5   :  { %v1203_v14 = vmax.f32 %v1048_v11, 0.0  ;;  %v358_v15 = vadd.f32 %v1966_v40, %v357_v12  ;;  %v892_v16 = vpack.c.bf16 %v839_v10, %v838_v8  ;;  %v95_v8 = vld [vmem:[%s2776_s0 + $0x1e0] sm:$0xff] }
 0x1c6   :  { %v129_v12 = vpack.c.bf16 %v96_v9, %v95_v8 }
 0x1c7   :  { %v459_v18 = vmax.f32 %v358_v15, 0.0  ;;  %1752 = vmatmul.msk.bf16.gmra.mxu2 %vm934_vm4, %v892_v16  ;;  %v1265_v19 = vpack.c.bf16 %v1203_v14, %v1202_v13 }
 0x1c8   :  { %v713_v20 = vpop.f32.mrf.mxu1 }
 0x1c9   :  { %v503_v23 = vpack.c.bf16 %v459_v18, %v458_v17  ;;  %1783 = vmatmul.msk.bf16.gmra.mxu3 %vm934_vm4, %v1265_v19  ;;  %v714_v27 = vadd.f32 %v2066_v5, %v713_v20 }
 0x1ca   :  { %v1050_v24 = vpop.f32.mrf.mxu2 }
 0x1cb   :  { %1721 = vmatmul.msk.bf16.gmra.mxu1 %vm552_vm3, %v503_v23  ;;  %v1051_v29 = vadd.f32 %v2195_v41, %v1050_v24  ;;  %v840_v32 = vmax.f32 %v714_v27, 0.0 }
 0x1cc   :  { %v360_v26 = vpop.f32.mrf.mxu0 }
 0x1cd   :  { %v361_v33 = vadd.f32 %v1966_v40, %v360_v26  ;;  %v1204_v37 = vmax.f32 %v1051_v29, 0.0 }
 0x1cf   :  { %1682 = vmatmul.msk.bf16.gmra.mxu0 %vm147_vm2, %v127_v25  ;;  %v460_v43 = vmax.f32 %v361_v33, 0.0  ;;  %v98_v33 = vld [vmem:[%s2776_s0 + $0x1f8] sm:$0xff] }
 0x1d0   :  { %v715_v28 = vpop.f32.mrf.mxu1 }
 0x1d1   :  { %v716_v30 = vadd.f32 %v2066_v5, %v715_v28 }
 0x1d2   :  { %v1052_v31 = vpop.f32.mrf.mxu2 }
 0x1d3   :  { %v841_v34 = vmax.f32 %v716_v30, 0.0  ;;  %v1053_v35 = vadd.f32 %v2195_v41, %v1052_v31 }
 0x1d4   :  { %v362_v36 = vpop.f32.mrf.mxu0 }
 0x1d5   :  { %v1205_v38 = vmax.f32 %v1053_v35, 0.0  ;;  %v363_v39 = vadd.f32 %v1966_v40, %v362_v36  ;;  %v893_v42 = vpack.c.bf16 %v841_v34, %v840_v32  ;;  %v97_v32 = vld [vmem:[%s2776_s0 + $0x1f0] sm:$0xff] }
 0x1d6   :  { %v130_v36 = vpack.c.bf16 %v98_v33, %v97_v32  ;;  %v2307_v33 = vld [vmem:[%s2775_s2] ss:$0 sm:$0xff] }
 0x1d7   :  { %v461_v44 = vmax.f32 %v363_v39, 0.0  ;;  %1753 = vmatmul.msk.bf16.gmra.mxu2 %vm934_vm4, %v893_v42  ;;  %v1266_v45 = vpack.c.bf16 %v1205_v38, %v1204_v37 }
 0x1d8   :  { %v718_v46 = vpop.f32.mrf.mxu1 }
 0x1d9   :  { %v504_v49 = vpack.c.bf16 %v461_v44, %v460_v43  ;;  %1784 = vmatmul.msk.bf16.gmra.mxu3 %vm934_vm4, %v1266_v45  ;;  %v719_v53 = vadd.f32 %v2066_v5, %v718_v46 }
 0x1da   :  { %v1055_v50 = vpop.f32.mrf.mxu2 }
 0x1db   :  { %1722 = vmatmul.msk.bf16.gmra.mxu1 %vm552_vm3, %v504_v49  ;;  %v1056_v55 = vadd.f32 %v2195_v41, %v1055_v50  ;;  %v842_v58 = vmax.f32 %v719_v53, 0.0 }
 0x1dc   :  { %v365_v52 = vpop.f32.mrf.mxu0 }
 0x1dd   :  { %v366_v59 = vadd.f32 %v1966_v40, %v365_v52  ;;  %v1206_v63 = vmax.f32 %v1056_v55, 0.0 }
 0x1df   :  { %1683 = vmatmul.msk.bf16.gmra.mxu0 %vm147_vm2, %v128_v51  ;;  %v462_v3 = vmax.f32 %v366_v59, 0.0 }
 0x1e0   :  { %v720_v54 = vpop.f32.mrf.mxu1 }
 0x1e1   :  { %v721_v56 = vadd.f32 %v2066_v5, %v720_v54 }
 0x1e2   :  { %v1057_v57 = vpop.f32.mrf.mxu2 }
 0x1e3   :  { %v843_v60 = vmax.f32 %v721_v56, 0.0  ;;  %v1058_v61 = vadd.f32 %v2195_v41, %v1057_v57 }
 0x1e4   :  { %v367_v62 = vpop.f32.mrf.mxu0 }
 0x1e5   :  { %v894_v0 = vpack.c.bf16 %v843_v60, %v842_v58  ;;  %v1207_v1 = vmax.f32 %v1058_v61, 0.0  ;;  %v368_v2 = vadd.f32 %v1966_v40, %v367_v62 }
 0x1e7   :  { %v463_v4 = vmax.f32 %v368_v2, 0.0  ;;  %1754 = vmatmul.msk.bf16.gmra.mxu2 %vm934_vm4, %v894_v0  ;;  %v1267_v6 = vpack.c.bf16 %v1207_v1, %v1206_v63 }
 0x1e8   :  { %v723_v7 = vpop.f32.mrf.mxu1 }
 0x1e9   :  { %v505_v10 = vpack.c.bf16 %v463_v4, %v462_v3  ;;  %1785 = vmatmul.msk.bf16.gmra.mxu3 %vm934_vm4, %v1267_v6  ;;  %v724_v14 = vadd.f32 %v2066_v5, %v723_v7  ;;  %v14_v7 = vstv %s2782_s8 }
 0x1ea   :  { %v1060_v11 = vpop.f32.mrf.mxu2  ;;  %15 = vst [vmem:[#allocation2] sm:$0x1] %v14_v7 }
 0x1eb   :  { %1723 = vmatmul.msk.bf16.gmra.mxu1 %vm552_vm3, %v505_v10  ;;  %v1061_v16 = vadd.f32 %v2195_v41, %v1060_v11  ;;  %v844_v19 = vmax.f32 %v724_v14, 0.0 }
 0x1ec   :  { %v370_v13 = vpop.f32.mrf.mxu0 }
 0x1ed   :  { %v371_v20 = vadd.f32 %v1966_v40, %v370_v13  ;;  %v1208_v24 = vmax.f32 %v1061_v16, 0.0 }
 0x1ef   :  { %1684 = vmatmul.msk.bf16.gmra.mxu0 %vm147_vm2, %v129_v12  ;;  %v464_v28 = vmax.f32 %v371_v20, 0.0 }
 0x1f0   :  { %v725_v15 = vpop.f32.mrf.mxu1 }
 0x1f1   :  { %v726_v17 = vadd.f32 %v2066_v5, %v725_v15 }
 0x1f2   :  { %v1062_v18 = vpop.f32.mrf.mxu2 }
 0x1f3   :  { %v845_v21 = vmax.f32 %v726_v17, 0.0  ;;  %v1063_v22 = vadd.f32 %v2195_v41, %v1062_v18 }
 0x1f4   :  { %v372_v23 = vpop.f32.mrf.mxu0 }
 0x1f5   :  { %v895_v25 = vpack.c.bf16 %v845_v21, %v844_v19  ;;  %v1209_v26 = vmax.f32 %v1063_v22, 0.0  ;;  %v373_v27 = vadd.f32 %v1966_v40, %v372_v23 }
 0x1f7   :  { %v465_v29 = vmax.f32 %v373_v27, 0.0  ;;  %1755 = vmatmul.msk.bf16.gmra.mxu2 %vm934_vm4, %v895_v25  ;;  %v1268_v30 = vpack.c.bf16 %v1209_v26, %v1208_v24 }
 0x1f8   :  { %v728_v31 = vpop.f32.mrf.mxu1 }
 0x1f9   :  { %v506_v34 = vpack.c.bf16 %v465_v29, %v464_v28  ;;  %1786 = vmatmul.msk.bf16.gmra.mxu3 %vm934_vm4, %v1268_v30  ;;  %v729_v38 = vadd.f32 %v2066_v5, %v728_v31 }
 0x1fa   :  { %v1065_v35 = vpop.f32.mrf.mxu2 }
 0x1fb   :  { %1724 = vmatmul.msk.bf16.gmra.mxu1 %vm552_vm3, %v506_v34  ;;  %v1066_v42 = vadd.f32 %v2195_v41, %v1065_v35  ;;  %v846_v45 = vmax.f32 %v729_v38, 0.0 }
 0x1fc   :  { %v375_v37 = vpop.f32.mrf.mxu0 }
 0x1fd   :  { %v376_v46 = vadd.f32 %v1966_v40, %v375_v37  ;;  %v1210_v50 = vmax.f32 %v1066_v42, 0.0 }
 0x1ff   :  { %1685 = vmatmul.msk.bf16.gmra.mxu0 %vm147_vm2, %v130_v36  ;;  %v466_v54 = vmax.f32 %v376_v46, 0.0 }
 0x200   :  { %v730_v39 = vpop.f32.mrf.mxu1 }
 0x201   :  { %v731_v43 = vadd.f32 %v2066_v5, %v730_v39 }
 0x202   :  { %v1067_v44 = vpop.f32.mrf.mxu2 }
 0x203   :  { %v847_v47 = vmax.f32 %v731_v43, 0.0  ;;  %v1068_v48 = vadd.f32 %v2195_v41, %v1067_v44 }
 0x204   :  { %v377_v49 = vpop.f32.mrf.mxu0 }
 0x205   :  { %v896_v51 = vpack.c.bf16 %v847_v47, %v846_v45  ;;  %v1211_v52 = vmax.f32 %v1068_v48, 0.0  ;;  %v378_v53 = vadd.f32 %v1966_v40, %v377_v49 }
 0x207   :  { %v467_v55 = vmax.f32 %v378_v53, 0.0  ;;  %1756 = vmatmul.msk.bf16.gmra.mxu2 %vm934_vm4, %v896_v51  ;;  %v1269_v56 = vpack.c.bf16 %v1211_v52, %v1210_v50 }
 0x208   :  { %v733_v57 = vpop.f32.mrf.mxu1 }
 0x209   :  { %v507_v58 = vpack.c.bf16 %v467_v55, %v466_v54  ;;  %1787 = vmatmul.msk.bf16.gmra.mxu3 %vm934_vm4, %v1269_v56  ;;  %v734_v61 = vadd.f32 %v2066_v5, %v733_v57 }
 0x20a   :  { %v1070_v59 = vpop.f32.mrf.mxu2 }
 0x20b   :  { %1725 = vmatmul.msk.bf16.gmra.mxu1 %vm552_vm3, %v507_v58  ;;  %v1071_v63 = vadd.f32 %v2195_v41, %v1070_v59  ;;  %v848_v1 = vmax.f32 %v734_v61, 0.0 }
 0x20c   :  { %v380_v60 = vpop.f32.mrf.mxu0 }
 0x20d   :  { %v381_v3 = vadd.f32 %v1966_v40, %v380_v60  ;;  %v1212_v9 = vmax.f32 %v1071_v63, 0.0 }
 0x20f   :  { %v468_v13 = vmax.f32 %v381_v3, 0.0 }
 0x210   :  { %v735_v62 = vpop.f32.mrf.mxu1 }
 0x211   :  { %v736_v0 = vadd.f32 %v2066_v5, %v735_v62  ;;  %v2321_v62 = vld [vmem:[#allocation2] ss:$0 sm:$0xff] }
 0x212   :  { %v1072_v2 = vpop.f32.mrf.mxu2 }
 0x213   :  { %v849_v4 = vmax.f32 %v736_v0, 0.0  ;;  %v1073_v6 = vadd.f32 %v2195_v41, %v1072_v2 }
 0x214   :  { %v382_v8 = vpop.f32.mrf.mxu0 }
 0x215   :  { %v897_v10 = vpack.c.bf16 %v849_v4, %v848_v1  ;;  %v1213_v11 = vmax.f32 %v1073_v6, 0.0  ;;  %v383_v12 = vadd.f32 %v1966_v40, %v382_v8 }
 0x217   :  { %v469_v14 = vmax.f32 %v383_v12, 0.0  ;;  %1757 = vmatmul.msk.bf16.gmra.mxu2 %vm934_vm4, %v897_v10  ;;  %v1270_v15 = vpack.c.bf16 %v1213_v11, %v1212_v9 }
 0x218   :  { %v738_v16 = vpop.f32.mrf.mxu1 }
 0x219   :  { %v508_v17 = vpack.c.bf16 %v469_v14, %v468_v13  ;;  %1788 = vmatmul.msk.bf16.gmra.mxu3 %vm934_vm4, %v1270_v15  ;;  %v739_v20 = vadd.f32 %v2066_v5, %v738_v16 }
 0x21a   :  { %v1075_v18 = vpop.f32.mrf.mxu2 }
 0x21b   :  { %1726 = vmatmul.msk.bf16.gmra.mxu1 %vm552_vm3, %v508_v17  ;;  %v1076_v22 = vadd.f32 %v2195_v41, %v1075_v18  ;;  %v850_v25 = vmax.f32 %v739_v20, 0.0 }
 0x21c   :  { %v385_v19 = vpop.f32.mrf.mxu0 }
 0x21d   :  { %v386_v26 = vadd.f32 %v1966_v40, %v385_v19  ;;  %v1214_v30 = vmax.f32 %v1076_v22, 0.0 }
 0x21f   :  { %v470_v35 = vmax.f32 %v386_v26, 0.0 }
 0x220   :  { %v740_v21 = vpop.f32.mrf.mxu1 }
 0x221   :  { %v741_v23 = vadd.f32 %v2066_v5, %v740_v21 }
 0x222   :  { %v1077_v24 = vpop.f32.mrf.mxu2 }
 0x223   :  { %v851_v27 = vmax.f32 %v741_v23, 0.0  ;;  %v1078_v28 = vadd.f32 %v2195_v41, %v1077_v24 }
 0x224   :  { %v387_v29 = vpop.f32.mrf.mxu0 }
 0x225   :  { %v898_v31 = vpack.c.bf16 %v851_v27, %v850_v25  ;;  %v1215_v32 = vmax.f32 %v1078_v28, 0.0  ;;  %v388_v34 = vadd.f32 %v2307_v33, %v387_v29 }
 0x227   :  { %v471_v36 = vmax.f32 %v388_v34, 0.0  ;;  %1758 = vmatmul.msk.bf16.gmra.mxu2 %vm934_vm4, %v898_v31  ;;  %v1271_v37 = vpack.c.bf16 %v1215_v32, %v1214_v30 }
 0x228   :  { %v743_v40 = vpop.f32.mrf.mxu1 }
 0x229   :  { %v509_v38 = vpack.c.bf16 %v471_v36, %v470_v35  ;;  %1789 = vmatmul.msk.bf16.gmra.mxu3 %vm934_vm4, %v1271_v37  ;;  %v744_v43 = vadd.f32 %v2066_v5, %v743_v40 }
 0x22a   :  { %v1080_v39 = vpop.f32.mrf.mxu2 }
 0x22b   :  { %1727 = vmatmul.msk.bf16.gmra.mxu1 %vm552_vm3, %v509_v38  ;;  %v1081_v45 = vadd.f32 %v2195_v41, %v1080_v39  ;;  %v852_v48 = vmax.f32 %v744_v43, 0.0 }
 0x22c   :  { %v390_v42 = vpop.f32.mrf.mxu0 }
 0x22d   :  { %v391_v49 = vadd.f32 %v2307_v33, %v390_v42  ;;  %v1216_v53 = vmax.f32 %v1081_v45, 0.0 }
 0x22f   :  { %v472_v57 = vmax.f32 %v391_v49, 0.0 }
 0x230   :  { %v745_v44 = vpop.f32.mrf.mxu1 }
 0x231   :  { %v746_v46 = vadd.f32 %v2066_v5, %v745_v44 }
 0x232   :  { %v1082_v47 = vpop.f32.mrf.mxu2 }
 0x233   :  { %v853_v50 = vmax.f32 %v746_v46, 0.0  ;;  %v1083_v51 = vadd.f32 %v2195_v41, %v1082_v47 }
 0x234   :  { %v392_v52 = vpop.f32.mrf.mxu0 }
 0x235   :  { %v899_v54 = vpack.c.bf16 %v853_v50, %v852_v48  ;;  %v1217_v55 = vmax.f32 %v1083_v51, 0.0  ;;  %v393_v56 = vadd.f32 %v2307_v33, %v392_v52 }
 0x237   :  { %v473_v58 = vmax.f32 %v393_v56, 0.0  ;;  %1759 = vmatmul.msk.bf16.gmra.mxu2 %vm934_vm4, %v899_v54  ;;  %v1272_v59 = vpack.c.bf16 %v1217_v55, %v1216_v53 }
 0x238   :  { %v748_v60 = vpop.f32.mrf.mxu1 }
 0x239   :  { %v510_v61 = vpack.c.bf16 %v473_v58, %v472_v57  ;;  %1790 = vmatmul.msk.bf16.gmra.mxu3 %vm934_vm4, %v1272_v59  ;;  %v749_v3 = vadd.f32 %v2066_v5, %v748_v60 }
 0x23a   :  { %v1085_v63 = vpop.f32.mrf.mxu2 }
 0x23b   :  { %1728 = vmatmul.msk.bf16.gmra.mxu1 %vm552_vm3, %v510_v61  ;;  %v1086_v4 = vadd.f32 %v2195_v41, %v1085_v63  ;;  %v854_v9 = vmax.f32 %v749_v3, 0.0 }
 0x23c   :  { %v395_v0 = vpop.f32.mrf.mxu0  ;;  %v1421_v1 = vpop.f32.mrf.mxu3 }
 0x23d   :  { %v1422_v2 = vadd.f32 %v2321_v62, %v1421_v1  ;;  %v396_v10 = vadd.f32 %v2307_v33, %v395_v0  ;;  %v1218_v13 = vmax.f32 %v1086_v4, 0.0 }
 0x23f   :  { %1582 = vst.msk [vmem:[%s2783_s9] sm:$0xff] %vm1581_vm5, %v1422_v2  ;;  %v474_v20 = vmax.f32 %v396_v10, 0.0 }
 0x240   :  { %v750_v6 = vpop.f32.mrf.mxu1 }
 0x241   :  { %v751_v7 = vadd.f32 %v2066_v5, %v750_v6 }
 0x242   :  { %v1087_v8 = vpop.f32.mrf.mxu2 }
 0x243   :  { %v855_v11 = vmax.f32 %v751_v7, 0.0  ;;  %v1088_v12 = vadd.f32 %v2195_v41, %v1087_v8 }
 0x244   :  { %v397_v14 = vpop.f32.mrf.mxu0  ;;  %v1423_v15 = vpop.f32.mrf.mxu3 }
 0x245   :  { %v900_v16 = vpack.c.bf16 %v855_v11, %v854_v9  ;;  %v1219_v17 = vmax.f32 %v1088_v12, 0.0  ;;  %v398_v18 = vadd.f32 %v2307_v33, %v397_v14  ;;  %v1424_v19 = vadd.f32 %v2321_v62, %v1423_v15 }
 0x247   :  { %v475_v21 = vmax.f32 %v398_v18, 0.0  ;;  %1583 = vst.msk [vmem:[%s2783_s9 + $0x8] sm:$0xff] %vm1581_vm5, %v1424_v19  ;;  %1760 = vmatmul.msk.bf16.gmra.mxu2 %vm934_vm4, %v900_v16  ;;  %v1273_v22 = vpack.c.bf16 %v1219_v17, %v1218_v13  ;;  %v2385_v18 = vld [vmem:[%s2778_s4] ss:$0 sm:$0xff] }
 0x248   :  { %v753_v23 = vpop.f32.mrf.mxu1 }
 0x249   :  { %v511_v24 = vpack.c.bf16 %v475_v21, %v474_v20  ;;  %1791 = vmatmul.msk.bf16.gmra.mxu3 %vm934_vm4, %v1273_v22  ;;  %v754_v29 = vadd.f32 %v2066_v5, %v753_v23 }
 0x24a   :  { %v1090_v25 = vpop.f32.mrf.mxu2 }
 0x24b   :  { %1729 = vmatmul.msk.bf16.gmra.mxu1 %vm552_vm3, %v511_v24  ;;  %v1091_v30 = vadd.f32 %v2195_v41, %v1090_v25  ;;  %v856_v35 = vmax.f32 %v754_v29, 0.0 }
 0x24c   :  { %v400_v26 = vpop.f32.mrf.mxu0  ;;  %v1426_v27 = vpop.f32.mrf.mxu3 }
 0x24d   :  { %v1427_v28 = vadd.f32 %v2321_v62, %v1426_v27  ;;  %v401_v36 = vadd.f32 %v2307_v33, %v400_v26  ;;  %v1220_v38 = vmax.f32 %v1091_v30, 0.0 }
 0x24f   :  { %1584 = vst.msk [vmem:[%s2783_s9 + $0x10] sm:$0xff] %vm1581_vm5, %v1427_v28  ;;  %v476_v47 = vmax.f32 %v401_v36, 0.0 }
 0x250   :  { %v755_v31 = vpop.f32.mrf.mxu1 }
 0x251   :  { %v756_v32 = vadd.f32 %v2066_v5, %v755_v31 }
 0x252   :  { %v1092_v34 = vpop.f32.mrf.mxu2 }
 0x253   :  { %v857_v37 = vmax.f32 %v756_v32, 0.0  ;;  %v1093_v40 = vadd.f32 %v2195_v41, %v1092_v34 }
 0x254   :  { %v402_v39 = vpop.f32.mrf.mxu0  ;;  %v1428_v42 = vpop.f32.mrf.mxu3 }
 0x255   :  { %v901_v43 = vpack.c.bf16 %v857_v37, %v856_v35  ;;  %v1221_v44 = vmax.f32 %v1093_v40, 0.0  ;;  %v403_v45 = vadd.f32 %v2307_v33, %v402_v39  ;;  %v1429_v46 = vadd.f32 %v2321_v62, %v1428_v42 }
 0x257   :  { %v477_v48 = vmax.f32 %v403_v45, 0.0  ;;  %1585 = vst.msk [vmem:[%s2783_s9 + $0x18] sm:$0xff] %vm1581_vm5, %v1429_v46  ;;  %1761 = vmatmul.msk.bf16.gmra.mxu2 %vm934_vm4, %v901_v43  ;;  %v1274_v49 = vpack.c.bf16 %v1221_v44, %v1220_v38 }
 0x258   :  { %v758_v50 = vpop.f32.mrf.mxu1 }
 0x259   :  { %v512_v51 = vpack.c.bf16 %v477_v48, %v476_v47  ;;  %1792 = vmatmul.msk.bf16.gmra.mxu3 %vm934_vm4, %v1274_v49  ;;  %v759_v56 = vadd.f32 %v2066_v5, %v758_v50 }
 0x25a   :  { %v1095_v52 = vpop.f32.mrf.mxu2 }
 0x25b   :  { %1730 = vmatmul.msk.bf16.gmra.mxu1 %vm552_vm3, %v512_v51  ;;  %v1096_v57 = vadd.f32 %v2195_v41, %v1095_v52  ;;  %v858_v61 = vmax.f32 %v759_v56, 0.0 }
 0x25c   :  { %v405_v53 = vpop.f32.mrf.mxu0  ;;  %v1431_v54 = vpop.f32.mrf.mxu3 }
 0x25d   :  { %v1432_v55 = vadd.f32 %v2321_v62, %v1431_v54  ;;  %v406_v63 = vadd.f32 %v2307_v33, %v405_v53  ;;  %v1222_v2 = vmax.f32 %v1096_v57, 0.0 }
 0x25f   :  { %1586 = vst.msk [vmem:[%s2783_s9 + $0x20] sm:$0xff] %vm1581_vm5, %v1432_v55  ;;  %v478_v10 = vmax.f32 %v406_v63, 0.0 }
 0x260   :  { %v760_v58 = vpop.f32.mrf.mxu1 }
 0x261   :  { %v761_v59 = vadd.f32 %v2066_v5, %v760_v58 }
 0x262   :  { %v1097_v60 = vpop.f32.mrf.mxu2 }
 0x263   :  { %v859_v0 = vmax.f32 %v761_v59, 0.0  ;;  %v1098_v1 = vadd.f32 %v2195_v41, %v1097_v60 }
 0x264   :  { %v407_v3 = vpop.f32.mrf.mxu0  ;;  %v1433_v4 = vpop.f32.mrf.mxu3 }
 0x265   :  { %v902_v6 = vpack.c.bf16 %v859_v0, %v858_v61  ;;  %v1223_v7 = vmax.f32 %v1098_v1, 0.0  ;;  %v408_v8 = vadd.f32 %v2307_v33, %v407_v3  ;;  %v1434_v9 = vadd.f32 %v2321_v62, %v1433_v4 }
 0x267   :  { %v479_v11 = vmax.f32 %v408_v8, 0.0  ;;  %1587 = vst.msk [vmem:[%s2783_s9 + $0x28] sm:$0xff] %vm1581_vm5, %v1434_v9  ;;  %1762 = vmatmul.msk.bf16.gmra.mxu2 %vm934_vm4, %v902_v6  ;;  %v1275_v5 = vpack.c.bf16 %v1223_v7, %v1222_v2 }
 0x268   :  { %v763_v12 = vpop.f32.mrf.mxu1 }
 0x269   :  { %v513_v13 = vpack.c.bf16 %v479_v11, %v478_v10  ;;  %1793 = vmatmul.msk.bf16.gmra.mxu3 %vm934_vm4, %v1275_v5  ;;  %v764_v19 = vadd.f32 %v2385_v18, %v763_v12 }
 0x26a   :  { %v1100_v14 = vpop.f32.mrf.mxu2 }
 0x26b   :  { %1731 = vmatmul.msk.bf16.gmra.mxu1 %vm552_vm3, %v513_v13  ;;  %v1101_v20 = vadd.f32 %v2195_v41, %v1100_v14  ;;  %v860_v24 = vmax.f32 %v764_v19, 0.0 }
 0x26c   :  { %v410_v15 = vpop.f32.mrf.mxu0  ;;  %v1436_v16 = vpop.f32.mrf.mxu3 }
 0x26d   :  { %v1437_v17 = vadd.f32 %v2321_v62, %v1436_v16  ;;  %v411_v25 = vadd.f32 %v2307_v33, %v410_v15  ;;  %v1224_v28 = vmax.f32 %v1101_v20, 0.0 }
 0x26f   :  { %1588 = vst.msk [vmem:[%s2783_s9 + $0x30] sm:$0xff] %vm1581_vm5, %v1437_v17  ;;  %v480_v36 = vmax.f32 %v411_v25, 0.0 }
 0x270   :  { %v765_v21 = vpop.f32.mrf.mxu1 }
 0x271   :  { %v766_v22 = vadd.f32 %v2385_v18, %v765_v21 }
 0x272   :  { %v1102_v23 = vpop.f32.mrf.mxu2 }
 0x273   :  { %v861_v26 = vmax.f32 %v766_v22, 0.0  ;;  %v1103_v27 = vadd.f32 %v2195_v41, %v1102_v23 }
 0x274   :  { %v412_v29 = vpop.f32.mrf.mxu0  ;;  %v1438_v30 = vpop.f32.mrf.mxu3 }
 0x275   :  { %v903_v31 = vpack.c.bf16 %v861_v26, %v860_v24  ;;  %v1225_v32 = vmax.f32 %v1103_v27, 0.0  ;;  %v413_v34 = vadd.f32 %v2307_v33, %v412_v29  ;;  %v1439_v35 = vadd.f32 %v2321_v62, %v1438_v30 }
 0x277   :  { %v1276_v37 = vpack.c.bf16 %v1225_v32, %v1224_v28  ;;  %v481_v40 = vmax.f32 %v413_v34, 0.0  ;;  %1589 = vst.msk [vmem:[%s2783_s9 + $0x38] sm:$0xff] %vm1581_vm5, %v1439_v35  ;;  %1763 = vmatmul.msk.bf16.gmra.mxu2 %vm934_vm4, %v903_v31 }
 0x278   :  { %v768_v38 = vpop.f32.mrf.mxu1 }
 0x279   :  { %v514_v39 = vpack.c.bf16 %v481_v40, %v480_v36  ;;  %1794 = vmatmul.msk.bf16.gmra.mxu3 %vm934_vm4, %v1276_v37  ;;  %v769_v46 = vadd.f32 %v2385_v18, %v768_v38 }
 0x27a   :  { %v1105_v42 = vpop.f32.mrf.mxu2 }
 0x27b   :  { %1732 = vmatmul.msk.bf16.gmra.mxu1 %vm552_vm3, %v514_v39  ;;  %v1106_v47 = vadd.f32 %v2195_v41, %v1105_v42  ;;  %v862_v51 = vmax.f32 %v769_v46, 0.0 }
 0x27c   :  { %v415_v43 = vpop.f32.mrf.mxu0  ;;  %v1441_v44 = vpop.f32.mrf.mxu3 }
 0x27d   :  { %v1442_v45 = vadd.f32 %v2321_v62, %v1441_v44  ;;  %v416_v52 = vadd.f32 %v2307_v33, %v415_v43  ;;  %v1226_v55 = vmax.f32 %v1106_v47, 0.0 }
 0x27f   :  { %1590 = vst.msk [vmem:[%s2783_s9 + $0x40] sm:$0xff] %vm1581_vm5, %v1442_v45  ;;  %v482_v63 = vmax.f32 %v416_v52, 0.0 }
 0x280   :  { %v770_v48 = vpop.f32.mrf.mxu1 }
 0x281   :  { %v771_v49 = vadd.f32 %v2385_v18, %v770_v48 }
 0x282   :  { %v1107_v50 = vpop.f32.mrf.mxu2 }
 0x283   :  { %v863_v53 = vmax.f32 %v771_v49, 0.0  ;;  %v1108_v54 = vadd.f32 %v2195_v41, %v1107_v50 }
 0x284   :  { %v417_v56 = vpop.f32.mrf.mxu0  ;;  %v1443_v57 = vpop.f32.mrf.mxu3 }
 0x285   :  { %v904_v58 = vpack.c.bf16 %v863_v53, %v862_v51  ;;  %v1227_v59 = vmax.f32 %v1108_v54, 0.0  ;;  %v418_v60 = vadd.f32 %v2307_v33, %v417_v56  ;;  %v1444_v61 = vadd.f32 %v2321_v62, %v1443_v57 }
 0x287   :  { %v1277_v0 = vpack.c.bf16 %v1227_v59, %v1226_v55  ;;  %v483_v1 = vmax.f32 %v418_v60, 0.0  ;;  %1591 = vst.msk [vmem:[%s2783_s9 + $0x48] sm:$0xff] %vm1581_vm5, %v1444_v61  ;;  %1764 = vmatmul.msk.bf16.gmra.mxu2 %vm934_vm4, %v904_v58 }
 0x288   :  { %v773_v2 = vpop.f32.mrf.mxu1 }
 0x289   :  { %v515_v3 = vpack.c.bf16 %v483_v1, %v482_v63  ;;  %1795 = vmatmul.msk.bf16.gmra.mxu3 %vm934_vm4, %v1277_v0  ;;  %v774_v7 = vadd.f32 %v2385_v18, %v773_v2 }
 0x28a   :  { %v1110_v4 = vpop.f32.mrf.mxu2 }
 0x28b   :  { %1733 = vmatmul.msk.bf16.gmra.mxu1 %vm552_vm3, %v515_v3  ;;  %v1111_v9 = vadd.f32 %v2195_v41, %v1110_v4  ;;  %v864_v5 = vmax.f32 %v774_v7, 0.0 }
 0x28c   :  { %v1446_v33 = vpop.f32.mrf.mxu3 }
 0x28d   :  { %v1447_v6 = vadd.f32 %v2321_v62, %v1446_v33  ;;  %v1228_v15 = vmax.f32 %v1111_v9, 0.0 }
 0x28f   :  { %1592 = vst.msk [vmem:[%s2783_s9 + $0x50] sm:$0xff] %vm1581_vm5, %v1447_v6 }
 0x290   :  { %v775_v8 = vpop.f32.mrf.mxu1 }
 0x291   :  { %v776_v10 = vadd.f32 %v2385_v18, %v775_v8 }
 0x292   :  { %v1112_v11 = vpop.f32.mrf.mxu2 }
 0x293   :  { %v865_v12 = vmax.f32 %v776_v10, 0.0  ;;  %v1113_v13 = vadd.f32 %v2195_v41, %v1112_v11 }
 0x294   :  { %v1448_v14 = vpop.f32.mrf.mxu3 }
 0x295   :  { %v905_v16 = vpack.c.bf16 %v865_v12, %v864_v5  ;;  %v1229_v17 = vmax.f32 %v1113_v13, 0.0  ;;  %v1449_v19 = vadd.f32 %v2321_v62, %v1448_v14 }
 0x297   :  { %v1278_v20 = vpack.c.bf16 %v1229_v17, %v1228_v15  ;;  %1593 = vst.msk [vmem:[%s2783_s9 + $0x58] sm:$0xff] %vm1581_vm5, %v1449_v19  ;;  %1765 = vmatmul.msk.bf16.gmra.mxu2 %vm934_vm4, %v905_v16 }
 0x298   :  { %v778_v21 = vpop.f32.mrf.mxu1 }
 0x299   :  { %1796 = vmatmul.msk.bf16.gmra.mxu3 %vm934_vm4, %v1278_v20  ;;  %v779_v25 = vadd.f32 %v2385_v18, %v778_v21 }
 0x29a   :  { %v1115_v22 = vpop.f32.mrf.mxu2 }
 0x29b   :  { %v1116_v27 = vadd.f32 %v2195_v41, %v1115_v22  ;;  %v866_v30 = vmax.f32 %v779_v25, 0.0 }
 0x29c   :  { %v1451_v23 = vpop.f32.mrf.mxu3 }
 0x29d   :  { %v1452_v24 = vadd.f32 %v2321_v62, %v1451_v23  ;;  %v1230_v35 = vmax.f32 %v1116_v27, 0.0 }
 0x29f   :  { %1594 = vst.msk [vmem:[%s2783_s9 + $0x60] sm:$0xff] %vm1581_vm5, %v1452_v24 }
 0x2a0   :  { %v780_v26 = vpop.f32.mrf.mxu1 }
 0x2a1   :  { %v781_v28 = vadd.f32 %v2385_v18, %v780_v26 }
 0x2a2   :  { %v1117_v29 = vpop.f32.mrf.mxu2 }
 0x2a3   :  { %v867_v31 = vmax.f32 %v781_v28, 0.0  ;;  %v1118_v32 = vadd.f32 %v2195_v41, %v1117_v29 }
 0x2a4   :  { %v1453_v34 = vpop.f32.mrf.mxu3 }
 0x2a5   :  { %v906_v36 = vpack.c.bf16 %v867_v31, %v866_v30  ;;  %v1231_v37 = vmax.f32 %v1118_v32, 0.0  ;;  %v1454_v40 = vadd.f32 %v2321_v62, %v1453_v34 }
 0x2a7   :  { %v1279_v38 = vpack.c.bf16 %v1231_v37, %v1230_v35  ;;  %1595 = vst.msk [vmem:[%s2783_s9 + $0x68] sm:$0xff] %vm1581_vm5, %v1454_v40  ;;  %1766 = vmatmul.msk.bf16.gmra.mxu2 %vm934_vm4, %v906_v36 }
 0x2a8   :  { %v783_v39 = vpop.f32.mrf.mxu1 }
 0x2a9   :  { %1797 = vmatmul.msk.bf16.gmra.mxu3 %vm934_vm4, %v1279_v38  ;;  %v784_v45 = vadd.f32 %v2385_v18, %v783_v39 }
 0x2aa   :  { %v1120_v42 = vpop.f32.mrf.mxu2 }
 0x2ab   :  { %v1121_v47 = vadd.f32 %v2195_v41, %v1120_v42  ;;  %v868_v50 = vmax.f32 %v784_v45, 0.0  ;;  %v2515_v45 = vld [vmem:[%s2780_s6] ss:$0 sm:$0xff] }
 0x2ac   :  { %v1456_v43 = vpop.f32.mrf.mxu3 }
 0x2ad   :  { %v1457_v44 = vadd.f32 %v2321_v62, %v1456_v43  ;;  %v1232_v54 = vmax.f32 %v1121_v47, 0.0 }
 0x2af   :  { %1596 = vst.msk [vmem:[%s2783_s9 + $0x70] sm:$0xff] %vm1581_vm5, %v1457_v44 }
 0x2b0   :  { %v785_v46 = vpop.f32.mrf.mxu1 }
 0x2b1   :  { %v786_v48 = vadd.f32 %v2385_v18, %v785_v46 }
 0x2b2   :  { %v1122_v49 = vpop.f32.mrf.mxu2 }
 0x2b3   :  { %v869_v51 = vmax.f32 %v786_v48, 0.0  ;;  %v1123_v52 = vadd.f32 %v2195_v41, %v1122_v49 }
 0x2b4   :  { %v1458_v53 = vpop.f32.mrf.mxu3 }
 0x2b5   :  { %v907_v55 = vpack.c.bf16 %v869_v51, %v868_v50  ;;  %v1233_v56 = vmax.f32 %v1123_v52, 0.0  ;;  %v1459_v57 = vadd.f32 %v2321_v62, %v1458_v53 }
 0x2b7   :  { %v1280_v58 = vpack.c.bf16 %v1233_v56, %v1232_v54  ;;  %1597 = vst.msk [vmem:[%s2783_s9 + $0x78] sm:$0xff] %vm1581_vm5, %v1459_v57  ;;  %1767 = vmatmul.msk.bf16.gmra.mxu2 %vm934_vm4, %v907_v55 }
 0x2b8   :  { %v788_v59 = vpop.f32.mrf.mxu1 }
 0x2b9   :  { %1798 = vmatmul.msk.bf16.gmra.mxu3 %vm934_vm4, %v1280_v58  ;;  %v789_v0 = vadd.f32 %v2385_v18, %v788_v59 }
 0x2ba   :  { %v1125_v60 = vpop.f32.mrf.mxu2 }
 0x2bb   :  { %v1126_v2 = vadd.f32 %v2195_v41, %v1125_v60  ;;  %v870_v33 = vmax.f32 %v789_v0, 0.0 }
 0x2bc   :  { %v1461_v61 = vpop.f32.mrf.mxu3 }
 0x2bd   :  { %v1462_v63 = vadd.f32 %v2321_v62, %v1461_v61  ;;  %v1234_v9 = vmax.f32 %v1126_v2, 0.0 }
 0x2bf   :  { %1598 = vst.msk [vmem:[%s2783_s9 + $0x80] sm:$0xff] %vm1581_vm5, %v1462_v63 }
 0x2c0   :  { %v790_v1 = vpop.f32.mrf.mxu1 }
 0x2c1   :  { %v791_v3 = vadd.f32 %v2385_v18, %v790_v1 }
 0x2c2   :  { %v1127_v4 = vpop.f32.mrf.mxu2 }
 0x2c3   :  { %v871_v6 = vmax.f32 %v791_v3, 0.0  ;;  %v1128_v7 = vadd.f32 %v2195_v41, %v1127_v4 }
 0x2c4   :  { %v1463_v8 = vpop.f32.mrf.mxu3 }
 0x2c5   :  { %v908_v10 = vpack.c.bf16 %v871_v6, %v870_v33  ;;  %v1235_v11 = vmax.f32 %v1128_v7, 0.0  ;;  %v1464_v5 = vadd.f32 %v2321_v62, %v1463_v8 }
 0x2c7   :  { %v1281_v12 = vpack.c.bf16 %v1235_v11, %v1234_v9  ;;  %1599 = vst.msk [vmem:[%s2783_s9 + $0x88] sm:$0xff] %vm1581_vm5, %v1464_v5  ;;  %1768 = vmatmul.msk.bf16.gmra.mxu2 %vm934_vm4, %v908_v10 }
 0x2c8   :  { %v793_v13 = vpop.f32.mrf.mxu1 }
 0x2c9   :  { %1799 = vmatmul.msk.bf16.gmra.mxu3 %vm934_vm4, %v1281_v12  ;;  %v794_v17 = vadd.f32 %v2385_v18, %v793_v13 }
 0x2ca   :  { %v1130_v14 = vpop.f32.mrf.mxu2 }
 0x2cb   :  { %v1131_v20 = vadd.f32 %v2195_v41, %v1130_v14  ;;  %v872_v23 = vmax.f32 %v794_v17, 0.0 }
 0x2cc   :  { %v1466_v15 = vpop.f32.mrf.mxu3 }
 0x2cd   :  { %v1467_v16 = vadd.f32 %v2321_v62, %v1466_v15  ;;  %v1236_v27 = vmax.f32 %v1131_v20, 0.0 }
 0x2cf   :  { %1600 = vst.msk [vmem:[%s2783_s9 + $0x90] sm:$0xff] %vm1581_vm5, %v1467_v16 }
 0x2d0   :  { %v795_v19 = vpop.f32.mrf.mxu1 }
 0x2d1   :  { %v796_v21 = vadd.f32 %v2385_v18, %v795_v19 }
 0x2d2   :  { %v1132_v22 = vpop.f32.mrf.mxu2 }
 0x2d3   :  { %v873_v24 = vmax.f32 %v796_v21, 0.0  ;;  %v1133_v25 = vadd.f32 %v2195_v41, %v1132_v22 }
 0x2d4   :  { %v1468_v26 = vpop.f32.mrf.mxu3 }
 0x2d5   :  { %v909_v28 = vpack.c.bf16 %v873_v24, %v872_v23  ;;  %v1237_v29 = vmax.f32 %v1133_v25, 0.0  ;;  %v1469_v30 = vadd.f32 %v2321_v62, %v1468_v26 }
 0x2d7   :  { %v1282_v31 = vpack.c.bf16 %v1237_v29, %v1236_v27  ;;  %1601 = vst.msk [vmem:[%s2783_s9 + $0x98] sm:$0xff] %vm1581_vm5, %v1469_v30  ;;  %1769 = vmatmul.msk.bf16.gmra.mxu2 %vm934_vm4, %v909_v28 }
 0x2d8   :  { %v798_v32 = vpop.f32.mrf.mxu1 }
 0x2d9   :  { %1800 = vmatmul.msk.bf16.gmra.mxu3 %vm934_vm4, %v1282_v31  ;;  %v799_v37 = vadd.f32 %v2385_v18, %v798_v32 }
 0x2da   :  { %v1135_v34 = vpop.f32.mrf.mxu2 }
 0x2db   :  { %v1136_v38 = vadd.f32 %v2195_v41, %v1135_v34  ;;  %v874_v43 = vmax.f32 %v799_v37, 0.0 }
 0x2dc   :  { %v1471_v35 = vpop.f32.mrf.mxu3 }
 0x2dd   :  { %v1472_v36 = vadd.f32 %v2321_v62, %v1471_v35  ;;  %v1238_v48 = vmax.f32 %v1136_v38, 0.0 }
 0x2df   :  { %1602 = vst.msk [vmem:[%s2783_s9 + $0xa0] sm:$0xff] %vm1581_vm5, %v1472_v36 }
 0x2e0   :  { %v800_v40 = vpop.f32.mrf.mxu1 }
 0x2e1   :  { %v801_v39 = vadd.f32 %v2385_v18, %v800_v40 }
 0x2e2   :  { %v1137_v42 = vpop.f32.mrf.mxu2 }
 0x2e3   :  { %v875_v44 = vmax.f32 %v801_v39, 0.0  ;;  %v1138_v46 = vadd.f32 %v2515_v45, %v1137_v42 }
 0x2e4   :  { %v1473_v47 = vpop.f32.mrf.mxu3 }
 0x2e5   :  { %v910_v49 = vpack.c.bf16 %v875_v44, %v874_v43  ;;  %v1239_v50 = vmax.f32 %v1138_v46, 0.0  ;;  %v1474_v51 = vadd.f32 %v2321_v62, %v1473_v47 }
 0x2e7   :  { %v1283_v52 = vpack.c.bf16 %v1239_v50, %v1238_v48  ;;  %1603 = vst.msk [vmem:[%s2783_s9 + $0xa8] sm:$0xff] %vm1581_vm5, %v1474_v51  ;;  %1770 = vmatmul.msk.bf16.gmra.mxu2 %vm934_vm4, %v910_v49 }
 0x2e8   :  { %v803_v41 = vpop.f32.mrf.mxu1 }
 0x2e9   :  { %1801 = vmatmul.msk.bf16.gmra.mxu3 %vm934_vm4, %v1283_v52  ;;  %v804_v56 = vadd.f32 %v2385_v18, %v803_v41 }
 0x2ea   :  { %v1140_v53 = vpop.f32.mrf.mxu2 }
 0x2eb   :  { %v1141_v58 = vadd.f32 %v2515_v45, %v1140_v53  ;;  %v876_v61 = vmax.f32 %v804_v56, 0.0 }
 0x2ec   :  { %v1476_v54 = vpop.f32.mrf.mxu3 }
 0x2ed   :  { %v1477_v55 = vadd.f32 %v2321_v62, %v1476_v54  ;;  %v1240_v2 = vmax.f32 %v1141_v58, 0.0 }
 0x2ef   :  { %1604 = vst.msk [vmem:[%s2783_s9 + $0xb0] sm:$0xff] %vm1581_vm5, %v1477_v55 }
 0x2f0   :  { %v805_v57 = vpop.f32.mrf.mxu1 }
 0x2f1   :  { %v806_v59 = vadd.f32 %v2385_v18, %v805_v57 }
 0x2f2   :  { %v1142_v60 = vpop.f32.mrf.mxu2 }
 0x2f3   :  { %v877_v63 = vmax.f32 %v806_v59, 0.0  ;;  %v1143_v0 = vadd.f32 %v2515_v45, %v1142_v60 }
 0x2f4   :  { %v1478_v1 = vpop.f32.mrf.mxu3 }
 0x2f5   :  { %v911_v3 = vpack.c.bf16 %v877_v63, %v876_v61  ;;  %v1241_v4 = vmax.f32 %v1143_v0, 0.0  ;;  %v1479_v33 = vadd.f32 %v2321_v62, %v1478_v1 }
 0x2f7   :  { %v1284_v6 = vpack.c.bf16 %v1241_v4, %v1240_v2  ;;  %1605 = vst.msk [vmem:[%s2783_s9 + $0xb8] sm:$0xff] %vm1581_vm5, %v1479_v33  ;;  %1771 = vmatmul.msk.bf16.gmra.mxu2 %vm934_vm4, %v911_v3 }
 0x2f8   :  { %v808_v7 = vpop.f32.mrf.mxu1 }
 0x2f9   :  { %1802 = vmatmul.msk.bf16.gmra.mxu3 %vm934_vm4, %v1284_v6  ;;  %v809_v11 = vadd.f32 %v2385_v18, %v808_v7 }
 0x2fa   :  { %v1145_v8 = vpop.f32.mrf.mxu2 }
 0x2fb   :  { %v1146_v12 = vadd.f32 %v2515_v45, %v1145_v8  ;;  %v878_v15 = vmax.f32 %v809_v11, 0.0 }
 0x2fc   :  { %v1481_v9 = vpop.f32.mrf.mxu3 }
 0x2fd   :  { %v1482_v10 = vadd.f32 %v2321_v62, %v1481_v9  ;;  %v1242_v20 = vmax.f32 %v1146_v12, 0.0 }
 0x2ff   :  { %1606 = vst.msk [vmem:[%s2783_s9 + $0xc0] sm:$0xff] %vm1581_vm5, %v1482_v10 }
 0x300   :  { %v810_v5 = vpop.f32.mrf.mxu1 }
 0x301   :  { %v811_v13 = vadd.f32 %v2385_v18, %v810_v5 }
 0x302   :  { %v1147_v14 = vpop.f32.mrf.mxu2 }
 0x303   :  { %v879_v16 = vmax.f32 %v811_v13, 0.0  ;;  %v1148_v17 = vadd.f32 %v2515_v45, %v1147_v14 }
 0x304   :  { %v1483_v19 = vpop.f32.mrf.mxu3 }
 0x305   :  { %v912_v21 = vpack.c.bf16 %v879_v16, %v878_v15  ;;  %v1243_v22 = vmax.f32 %v1148_v17, 0.0  ;;  %v1484_v23 = vadd.f32 %v2321_v62, %v1483_v19 }
 0x307   :  { %v1285_v24 = vpack.c.bf16 %v1243_v22, %v1242_v20  ;;  %1607 = vst.msk [vmem:[%s2783_s9 + $0xc8] sm:$0xff] %vm1581_vm5, %v1484_v23  ;;  %1772 = vmatmul.msk.bf16.gmra.mxu2 %vm934_vm4, %v912_v21 }
 0x308   :  { %v813_v25 = vpop.f32.mrf.mxu1 }
 0x309   :  { %1803 = vmatmul.msk.bf16.gmra.mxu3 %vm934_vm4, %v1285_v24  ;;  %v814_v29 = vadd.f32 %v2385_v18, %v813_v25 }
 0x30a   :  { %v1150_v26 = vpop.f32.mrf.mxu2 }
 0x30b   :  { %v1151_v31 = vadd.f32 %v2515_v45, %v1150_v26  ;;  %v880_v35 = vmax.f32 %v814_v29, 0.0 }
 0x30c   :  { %v1486_v27 = vpop.f32.mrf.mxu3 }
 0x30d   :  { %v1487_v28 = vadd.f32 %v2321_v62, %v1486_v27  ;;  %v1244_v38 = vmax.f32 %v1151_v31, 0.0 }
 0x30f   :  { %1608 = vst.msk [vmem:[%s2783_s9 + $0xd0] sm:$0xff] %vm1581_vm5, %v1487_v28 }
 0x310   :  { %v815_v30 = vpop.f32.mrf.mxu1 }
 0x311   :  { %v816_v32 = vadd.f32 %v2385_v18, %v815_v30 }
 0x312   :  { %v1152_v34 = vpop.f32.mrf.mxu2 }
 0x313   :  { %v881_v36 = vmax.f32 %v816_v32, 0.0  ;;  %v1153_v37 = vadd.f32 %v2515_v45, %v1152_v34 }
 0x314   :  { %v1488_v40 = vpop.f32.mrf.mxu3 }
 0x315   :  { %v913_v39 = vpack.c.bf16 %v881_v36, %v880_v35  ;;  %v1245_v42 = vmax.f32 %v1153_v37, 0.0  ;;  %v1489_v43 = vadd.f32 %v2321_v62, %v1488_v40 }
 0x317   :  { %v1286_v44 = vpack.c.bf16 %v1245_v42, %v1244_v38  ;;  %1609 = vst.msk [vmem:[%s2783_s9 + $0xd8] sm:$0xff] %vm1581_vm5, %v1489_v43  ;;  %1773 = vmatmul.msk.bf16.gmra.mxu2 %vm934_vm4, %v913_v39 }
 0x319   :  { %1804 = vmatmul.msk.bf16.gmra.mxu3 %vm934_vm4, %v1286_v44 }
 0x31a   :  { %v1155_v18 = vpop.f32.mrf.mxu2 }
 0x31b   :  { %v1156_v48 = vadd.f32 %v2515_v45, %v1155_v18 }
 0x31c   :  { %v1491_v46 = vpop.f32.mrf.mxu3 }
 0x31d   :  { %v1492_v47 = vadd.f32 %v2321_v62, %v1491_v46  ;;  %v1246_v52 = vmax.f32 %v1156_v48, 0.0 }
 0x31f   :  { %1610 = vst.msk [vmem:[%s2783_s9 + $0xe0] sm:$0xff] %vm1581_vm5, %v1492_v47 }
 0x322   :  { %v1157_v49 = vpop.f32.mrf.mxu2 }
 0x323   :  { %v1158_v50 = vadd.f32 %v2515_v45, %v1157_v49 }
 0x324   :  { %v1493_v51 = vpop.f32.mrf.mxu3 }
 0x325   :  { %v1247_v41 = vmax.f32 %v1158_v50, 0.0  ;;  %v1494_v53 = vadd.f32 %v2321_v62, %v1493_v51 }
 0x327   :  { %v1287_v54 = vpack.c.bf16 %v1247_v41, %v1246_v52  ;;  %1611 = vst.msk [vmem:[%s2783_s9 + $0xe8] sm:$0xff] %vm1581_vm5, %v1494_v53 }
 0x329   :  { %1805 = vmatmul.msk.bf16.gmra.mxu3 %vm934_vm4, %v1287_v54 }
 0x32a   :  { %v1160_v55 = vpop.f32.mrf.mxu2 }
 0x32b   :  { %v1161_v58 = vadd.f32 %v2515_v45, %v1160_v55 }
 0x32c   :  { %v1496_v56 = vpop.f32.mrf.mxu3 }
 0x32d   :  { %v1497_v57 = vadd.f32 %v2321_v62, %v1496_v56  ;;  %v1248_v63 = vmax.f32 %v1161_v58, 0.0 }
 0x32f   :  { %1612 = vst.msk [vmem:[%s2783_s9 + $0xf0] sm:$0xff] %vm1581_vm5, %v1497_v57 }
 0x332   :  { %v1162_v59 = vpop.f32.mrf.mxu2 }
 0x333   :  { %v1163_v60 = vadd.f32 %v2515_v45, %v1162_v59 }
 0x334   :  { %v1498_v61 = vpop.f32.mrf.mxu3 }
 0x335   :  { %v1249_v0 = vmax.f32 %v1163_v60, 0.0  ;;  %v1499_v1 = vadd.f32 %v2321_v62, %v1498_v61 }
 0x337   :  { %v1288_v2 = vpack.c.bf16 %v1249_v0, %v1248_v63  ;;  %1613 = vst.msk [vmem:[%s2783_s9 + $0xf8] sm:$0xff] %vm1581_vm5, %v1499_v1 }
 0x339   :  { %1806 = vmatmul.msk.bf16.gmra.mxu3 %vm934_vm4, %v1288_v2 }
 0x33a   :  { %v1165_v3 = vpop.f32.mrf.mxu2 }
 0x33b   :  { %v1166_v6 = vadd.f32 %v2515_v45, %v1165_v3 }
 0x33c   :  { %v1501_v4 = vpop.f32.mrf.mxu3 }
 0x33d   :  { %v1502_v33 = vadd.f32 %v2321_v62, %v1501_v4  ;;  %v1250_v10 = vmax.f32 %v1166_v6, 0.0 }
 0x33f   :  { %1614 = vst.msk [vmem:[%s2783_s9 + $0x100] sm:$0xff] %vm1581_vm5, %v1502_v33 }
 0x342   :  { %v1167_v7 = vpop.f32.mrf.mxu2 }
 0x343   :  { %v1168_v8 = vadd.f32 %v2515_v45, %v1167_v7 }
 0x344   :  { %v1503_v9 = vpop.f32.mrf.mxu3 }
 0x345   :  { %v1251_v11 = vmax.f32 %v1168_v8, 0.0  ;;  %v1504_v5 = vadd.f32 %v2321_v62, %v1503_v9 }
 0x347   :  { %v1289_v12 = vpack.c.bf16 %v1251_v11, %v1250_v10  ;;  %1615 = vst.msk [vmem:[%s2783_s9 + $0x108] sm:$0xff] %vm1581_vm5, %v1504_v5 }
 0x349   :  { %1807 = vmatmul.msk.bf16.gmra.mxu3 %vm934_vm4, %v1289_v12 }
 0x34a   :  { %v1170_v13 = vpop.f32.mrf.mxu2 }
 0x34b   :  { %v1171_v16 = vadd.f32 %v2515_v45, %v1170_v13 }
 0x34c   :  { %v1506_v14 = vpop.f32.mrf.mxu3 }
 0x34d   :  { %v1507_v15 = vadd.f32 %v2321_v62, %v1506_v14  ;;  %v1252_v21 = vmax.f32 %v1171_v16, 0.0 }
 0x34f   :  { %1616 = vst.msk [vmem:[%s2783_s9 + $0x110] sm:$0xff] %vm1581_vm5, %v1507_v15 }
 0x352   :  { %v1172_v17 = vpop.f32.mrf.mxu2 }
 0x353   :  { %v1173_v19 = vadd.f32 %v2515_v45, %v1172_v17 }
 0x354   :  { %v1508_v20 = vpop.f32.mrf.mxu3 }
 0x355   :  { %v1253_v22 = vmax.f32 %v1173_v19, 0.0  ;;  %v1509_v23 = vadd.f32 %v2321_v62, %v1508_v20 }
 0x357   :  { %v1290_v24 = vpack.c.bf16 %v1253_v22, %v1252_v21  ;;  %1617 = vst.msk [vmem:[%s2783_s9 + $0x118] sm:$0xff] %vm1581_vm5, %v1509_v23 }
 0x359   :  { %1808 = vmatmul.msk.bf16.gmra.mxu3 %vm934_vm4, %v1290_v24 }
 0x35a   :  { %v1175_v25 = vpop.f32.mrf.mxu2 }
 0x35b   :  { %v1176_v28 = vadd.f32 %v2515_v45, %v1175_v25 }
 0x35c   :  { %v1511_v26 = vpop.f32.mrf.mxu3 }
 0x35d   :  { %v1512_v27 = vadd.f32 %v2321_v62, %v1511_v26  ;;  %v1254_v32 = vmax.f32 %v1176_v28, 0.0 }
 0x35f   :  { %1618 = vst.msk [vmem:[%s2783_s9 + $0x120] sm:$0xff] %vm1581_vm5, %v1512_v27 }
 0x362   :  { %v1177_v29 = vpop.f32.mrf.mxu2 }
 0x363   :  { %v1178_v30 = vadd.f32 %v2515_v45, %v1177_v29 }
 0x364   :  { %v1513_v31 = vpop.f32.mrf.mxu3 }
 0x365   :  { %v1255_v34 = vmax.f32 %v1178_v30, 0.0  ;;  %v1514_v35 = vadd.f32 %v2321_v62, %v1513_v31 }
 0x367   :  { %v1291_v36 = vpack.c.bf16 %v1255_v34, %v1254_v32  ;;  %1619 = vst.msk [vmem:[%s2783_s9 + $0x128] sm:$0xff] %vm1581_vm5, %v1514_v35 }
 0x369   :  { %1809 = vmatmul.msk.bf16.gmra.mxu3 %vm934_vm4, %v1291_v36 }
 0x36a   :  { %v1180_v37 = vpop.f32.mrf.mxu2 }
 0x36b   :  { %v1181_v39 = vadd.f32 %v2515_v45, %v1180_v37 }
 0x36c   :  { %v1516_v40 = vpop.f32.mrf.mxu3 }
 0x36d   :  { %v1517_v38 = vadd.f32 %v2321_v62, %v1516_v40  ;;  %v1256_v18 = vmax.f32 %v1181_v39, 0.0 }
 0x36f   :  { %1620 = vst.msk [vmem:[%s2783_s9 + $0x130] sm:$0xff] %vm1581_vm5, %v1517_v38 }
 0x372   :  { %v1182_v42 = vpop.f32.mrf.mxu2 }
 0x373   :  { %v1183_v43 = vadd.f32 %v2515_v45, %v1182_v42 }
 0x374   :  { %v1518_v44 = vpop.f32.mrf.mxu3 }
 0x375   :  { %v1257_v46 = vmax.f32 %v1183_v43, 0.0  ;;  %v1519_v47 = vadd.f32 %v2321_v62, %v1518_v44  ;;  %v1831_v44 = vld [vmem:[#allocation2] ss:$0 sm:$0xff] }
 0x377   :  { %v1292_v48 = vpack.c.bf16 %v1257_v46, %v1256_v18  ;;  %1621 = vst.msk [vmem:[%s2783_s9 + $0x138] sm:$0xff] %vm1581_vm5, %v1519_v47 }
 0x379   :  { %1810 = vmatmul.msk.bf16.gmra.mxu3 %vm934_vm4, %v1292_v48 }
 0x37a   :  { %v1185_v49 = vpop.f32.mrf.mxu2 }
 0x37b   :  { %v1186_v52 = vadd.f32 %v2515_v45, %v1185_v49 }
 0x37c   :  { %v1521_v50 = vpop.f32.mrf.mxu3 }
 0x37d   :  { %v1522_v51 = vadd.f32 %v2321_v62, %v1521_v50  ;;  %v1258_v55 = vmax.f32 %v1186_v52, 0.0 }
 0x37f   :  { %1622 = vst.msk [vmem:[%s2783_s9 + $0x140] sm:$0xff] %vm1581_vm5, %v1522_v51 }
 0x382   :  { %v1187_v41 = vpop.f32.mrf.mxu2 }
 0x383   :  { %v1188_v53 = vadd.f32 %v2515_v45, %v1187_v41 }
 0x384   :  { %v1523_v54 = vpop.f32.mrf.mxu3 }
 0x385   :  { %v1259_v56 = vmax.f32 %v1188_v53, 0.0  ;;  %v1524_v57 = vadd.f32 %v2321_v62, %v1523_v54 }
 0x387   :  { %v1293_v58 = vpack.c.bf16 %v1259_v56, %v1258_v55  ;;  %1623 = vst.msk [vmem:[%s2783_s9 + $0x148] sm:$0xff] %vm1581_vm5, %v1524_v57 }
 0x389   :  { %1811 = vmatmul.msk.bf16.gmra.mxu3 %vm934_vm4, %v1293_v58 }
 0x38a   :  { %v1190_v59 = vpop.f32.mrf.mxu2 }
 0x38b   :  { %v1191_v63 = vadd.f32 %v2515_v45, %v1190_v59 }
 0x38c   :  { %v1526_v60 = vpop.f32.mrf.mxu3 }
 0x38d   :  { %v1527_v61 = vadd.f32 %v2321_v62, %v1526_v60  ;;  %v1260_v3 = vmax.f32 %v1191_v63, 0.0 }
 0x38f   :  { %1624 = vst.msk [vmem:[%s2783_s9 + $0x150] sm:$0xff] %vm1581_vm5, %v1527_v61 }
 0x392   :  { %v1192_v0 = vpop.f32.mrf.mxu2 }
 0x393   :  { %v1193_v1 = vadd.f32 %v2515_v45, %v1192_v0 }
 0x394   :  { %v1528_v2 = vpop.f32.mrf.mxu3 }
 0x395   :  { %v1261_v4 = vmax.f32 %v1193_v1, 0.0  ;;  %v1529_v33 = vadd.f32 %v2321_v62, %v1528_v2 }
 0x397   :  { %v1294_v6 = vpack.c.bf16 %v1261_v4, %v1260_v3  ;;  %1625 = vst.msk [vmem:[%s2783_s9 + $0x158] sm:$0xff] %vm1581_vm5, %v1529_v33 }
 0x399   :  { %1812 = vmatmul.msk.bf16.gmra.mxu3 %vm934_vm4, %v1294_v6 }
 0x39a   :  { %v1195_v7 = vpop.f32.mrf.mxu2 }
 0x39b   :  { %v1196_v10 = vadd.f32 %v2515_v45, %v1195_v7 }
 0x39c   :  { %v1531_v8 = vpop.f32.mrf.mxu3 }
 0x39d   :  { %v1532_v9 = vadd.f32 %v2321_v62, %v1531_v8  ;;  %v1262_v13 = vmax.f32 %v1196_v10, 0.0 }
 0x39f   :  { %1626 = vst.msk [vmem:[%s2783_s9 + $0x160] sm:$0xff] %vm1581_vm5, %v1532_v9 }
 0x3a2   :  { %v1197_v11 = vpop.f32.mrf.mxu2 }
 0x3a3   :  { %v1198_v5 = vadd.f32 %v2515_v45, %v1197_v11 }
 0x3a4   :  { %v1533_v12 = vpop.f32.mrf.mxu3 }
 0x3a5   :  { %v1263_v14 = vmax.f32 %v1198_v5, 0.0  ;;  %v1534_v15 = vadd.f32 %v2321_v62, %v1533_v12 }
 0x3a7   :  { %v1295_v16 = vpack.c.bf16 %v1263_v14, %v1262_v13  ;;  %1627 = vst.msk [vmem:[%s2783_s9 + $0x168] sm:$0xff] %vm1581_vm5, %v1534_v15 }
 0x3a9   :  { %1813 = vmatmul.msk.bf16.gmra.mxu3 %vm934_vm4, %v1295_v16 }
 0x3ac   :  { %v1536_v17 = vpop.f32.mrf.mxu3 }
 0x3ad   :  { %v1537_v19 = vadd.f32 %v2321_v62, %v1536_v17 }
 0x3af   :  { %1628 = vst.msk [vmem:[%s2783_s9 + $0x170] sm:$0xff] %vm1581_vm5, %v1537_v19 }
 0x3b4   :  { %v1538_v45 = vpop.f32.mrf.mxu3 }
 0x3b5   :  { %v1539_v20 = vadd.f32 %v2321_v62, %v1538_v45 }
 0x3b7   :  { %1629 = vst.msk [vmem:[%s2783_s9 + $0x178] sm:$0xff] %vm1581_vm5, %v1539_v20 }
 0x3bc   :  { %v1541_v21 = vpop.f32.mrf.mxu3 }
 0x3bd   :  { %v1542_v22 = vadd.f32 %v2321_v62, %v1541_v21 }
 0x3bf   :  { %1630 = vst.msk [vmem:[%s2783_s9 + $0x180] sm:$0xff] %vm1581_vm5, %v1542_v22 }
 0x3c4   :  { %v1543_v23 = vpop.f32.mrf.mxu3 }
 0x3c5   :  { %v1544_v24 = vadd.f32 %v2321_v62, %v1543_v23 }
 0x3c7   :  { %1631 = vst.msk [vmem:[%s2783_s9 + $0x188] sm:$0xff] %vm1581_vm5, %v1544_v24 }
 0x3cc   :  { %v1546_v25 = vpop.f32.mrf.mxu3 }
 0x3cd   :  { %v1547_v26 = vadd.f32 %v2321_v62, %v1546_v25 }
 0x3cf   :  { %1632 = vst.msk [vmem:[%s2783_s9 + $0x190] sm:$0xff] %vm1581_vm5, %v1547_v26 }
 0x3d4   :  { %v1548_v27 = vpop.f32.mrf.mxu3 }
 0x3d5   :  { %v1549_v28 = vadd.f32 %v2321_v62, %v1548_v27 }
 0x3d7   :  { %1633 = vst.msk [vmem:[%s2783_s9 + $0x198] sm:$0xff] %vm1581_vm5, %v1549_v28 }
 0x3dc   :  { %v1551_v29 = vpop.f32.mrf.mxu3 }
 0x3dd   :  { %v1552_v30 = vadd.f32 %v2321_v62, %v1551_v29 }
 0x3df   :  { %1634 = vst.msk [vmem:[%s2783_s9 + $0x1a0] sm:$0xff] %vm1581_vm5, %v1552_v30 }
 0x3e4   :  { %v1553_v31 = vpop.f32.mrf.mxu3 }
 0x3e5   :  { %v1554_v32 = vadd.f32 %v2321_v62, %v1553_v31 }
 0x3e7   :  { %1635 = vst.msk [vmem:[%s2783_s9 + $0x1a8] sm:$0xff] %vm1581_vm5, %v1554_v32 }
 0x3ec   :  { %v1556_v34 = vpop.f32.mrf.mxu3 }
 0x3ed   :  { %v1557_v35 = vadd.f32 %v2321_v62, %v1556_v34 }
 0x3ef   :  { %1636 = vst.msk [vmem:[%s2783_s9 + $0x1b0] sm:$0xff] %vm1581_vm5, %v1557_v35 }
 0x3f4   :  { %v1558_v36 = vpop.f32.mrf.mxu3 }
 0x3f5   :  { %v1559_v37 = vadd.f32 %v2321_v62, %v1558_v36 }
 0x3f7   :  { %1637 = vst.msk [vmem:[%s2783_s9 + $0x1b8] sm:$0xff] %vm1581_vm5, %v1559_v37 }
 0x3fc   :  { %v1561_v40 = vpop.f32.mrf.mxu3 }
 0x3fd   :  { %v1562_v38 = vadd.f32 %v2321_v62, %v1561_v40 }
 0x3ff   :  { %1638 = vst.msk [vmem:[%s2783_s9 + $0x1c0] sm:$0xff] %vm1581_vm5, %v1562_v38 }
 0x404   :  { %v1563_v39 = vpop.f32.mrf.mxu3 }
 0x405   :  { %v1564_v42 = vadd.f32 %v2321_v62, %v1563_v39 }
 0x407   :  { %1639 = vst.msk [vmem:[%s2783_s9 + $0x1c8] sm:$0xff] %vm1581_vm5, %v1564_v42 }
 0x40c   :  { %v1566_v43 = vpop.f32.mrf.mxu3 }
 0x40d   :  { %v1567_v18 = vadd.f32 %v1831_v44, %v1566_v43 }
 0x40f   :  { %1640 = vst.msk [vmem:[%s2783_s9 + $0x1d0] sm:$0xff] %vm1581_vm5, %v1567_v18 }
 0x414   :  { %v1568_v46 = vpop.f32.mrf.mxu3 }
 0x415   :  { %v1569_v47 = vadd.f32 %v1831_v44, %v1568_v46 }
 0x417   :  { %1641 = vst.msk [vmem:[%s2783_s9 + $0x1d8] sm:$0xff] %vm1581_vm5, %v1569_v47 }
 0x41c   :  { %v1571_v62 = vpop.f32.mrf.mxu3 }
 0x41d   :  { %v1572_v48 = vadd.f32 %v1831_v44, %v1571_v62 }
 0x41f   :  { %1642 = vst.msk [vmem:[%s2783_s9 + $0x1e0] sm:$0xff] %vm1581_vm5, %v1572_v48 }
 0x424   :  { %v1573_v49 = vpop.f32.mrf.mxu3 }
 0x425   :  { %v1574_v50 = vadd.f32 %v1831_v44, %v1573_v49 }
 0x427   :  { %1643 = vst.msk [vmem:[%s2783_s9 + $0x1e8] sm:$0xff] %vm1581_vm5, %v1574_v50 }
 0x42c   :  { %v1576_v51 = vpop.f32.mrf.mxu3 }
 0x42d   :  { %v1577_v52 = vadd.f32 %v1831_v44, %v1576_v51 }
 0x42f   :  { %1644 = vst.msk [vmem:[%s2783_s9 + $0x1f0] sm:$0xff] %vm1581_vm5, %v1577_v52 }
 0x434   :  { %v1578_v41 = vpop.f32.mrf.mxu3 }
 0x435   :  { %v1579_v53 = vadd.f32 %v1831_v44, %v1578_v41 }
 0x437   :  { %1645 = vst.msk [vmem:[%s2783_s9 + $0x1f8] sm:$0xff] %vm1581_vm5, %v1579_v53 }

</bundles_post_ra>
